<compile_context>
chip_gen: v6e
topology: v6e:2x2x1
jax: 0.10.0
libtpu: 0.0.40
codegen_flags: <defaults>
</compile_context>

<pallas_src>
import math

import jax
import jax.numpy as jnp
from jax.experimental import pallas as pl
from jax.experimental.pallas import tpu as pltpu

SEQ_LEN = 8            # seq_len
EMB = 32               # embedding_dim
HEADS = 4              # num_heads
HEAD_DIM = EMB // HEADS
HIDDEN = 32 * EMB      # MLP hidden dim (32 * embedding_dim)
MLP_CHUNK = 256        # hidden-dim chunk processed at a time (bounds VMEM live set)
EPS = 1e-5             # nn.LayerNorm default eps
NEG_BIG = -1e30        # finite mask value (avoids inf-inf NaN hazards)


def _ln_normalize(x):
    # LayerNorm without the affine part (gamma/beta are folded into the next matmul).
    mu = jnp.mean(x, axis=-1, keepdims=True)
    xc = x - mu
    var = jnp.mean(xc * xc, axis=-1, keepdims=True)
    return xc * jax.lax.rsqrt(var + EPS)


def _gelu_exact(x):
    # PyTorch nn.GELU() default = exact (erf-based) GELU.
    # erf via Abramowitz&Stegun 7.1.26 evaluated on |x|/sqrt(2); the sign is handled by the
    # final select, so Phi(x) = where(x>=0, 1-c, c) with c = 0.5*poly*exp(-z^2) = Phi(-|x|).
    a1, a2, a3, a4, a5 = 0.254829592, -0.284496736, 1.421413741, -1.453152027, 1.061405429
    p = 0.3275911
    z = jnp.abs(x) * 0.7071067811865476
    t = pl.reciprocal(1.0 + p * z, approx=True)          # EUP slot
    poly = ((((a5 * t + a4) * t + a3) * t + a2) * t + a1) * t
    c = 0.5 * poly * jnp.exp(-z * z)
    cdf = jnp.where(x >= 0.0, 1.0 - c, c)
    return x * cdf


def transformer_block_kernel(
    x_ref,                 # (rows, E)      f32   rows = TB * SEQ_LEN
    wqkv_ref, bqkv_ref,    # (E, 3E) f32, (1, 3E) f32   (LN1 affine + q-scale folded in)
    wo_ref, bo_ref,        # (E, E)  f32, (1, E)  f32
    seg_ref, segT_ref,     # (E, HEADS) f32, (HEADS, E) f32   one-hot head-segment matrices
    w1_ref, b1_ref,        # (E, H)  bf16, (1, H) f32   (LN2 affine folded in)
    w2_ref, b2_ref,        # (H, E)  bf16, (1, E) f32
    o_ref,                 # (rows, E)      f32
):
    rows = x_ref.shape[0]
    tb = rows // SEQ_LEN

    x = x_ref[...]                                        # (rows, E)

    # ---- LayerNorm1 (affine folded) + fused QKV projection (q-scale folded) ----
    nx = _ln_normalize(x)
    qkv = jnp.dot(nx, wqkv_ref[...], preferred_element_type=jnp.float32) + bqkv_ref[...]
    q3 = qkv[:, :EMB].reshape(tb, SEQ_LEN, EMB)           # trivial sublane split (S == 8)
    k3 = qkv[:, EMB:2 * EMB].reshape(tb, SEQ_LEN, EMB)
    v3 = qkv[:, 2 * EMB:].reshape(tb, SEQ_LEN, EMB)

    seg = seg_ref[...]                                    # (E, HEADS)
    segT = segT_ref[...]                                  # (HEADS, E)
    # query position inside each sequence (rows are sequence-major, position-minor; S = 8 = 2^3)
    ipos = jax.lax.broadcasted_iota(jnp.int32, (rows, 1), 0) & (SEQ_LEN - 1)

    # ---- causal multi-head attention, vectorized over all rows (no batched matmuls) ----
    # scores[j][r, h] = <q[row r, head h], k[seq(r), position j, head h]>
    scores = []
    for j in range(SEQ_LEN):                              # static unroll over 8 key positions
        prod = (q3 * k3[:, j:j + 1, :]).reshape(rows, EMB)          # VPU, sublane broadcast
        sj = jnp.dot(prod, seg, preferred_element_type=jnp.float32)  # per-head segment sum
        scores.append(jnp.where(ipos >= j, sj, NEG_BIG))
    s = jnp.stack(scores, axis=0)                         # (S, rows, HEADS)
    m = jnp.max(s, axis=0)                                # per-(row, head) max
    pexp = jnp.exp(s - m)                                 # masked entries -> exp(-1e30) == 0
    inv = pl.reciprocal(jnp.sum(pexp, axis=0), approx=True)

    ctx3 = jnp.zeros((tb, SEQ_LEN, EMB), jnp.float32)
    for j in range(SEQ_LEN):
        wj = jnp.dot(pexp[j] * inv, segT, preferred_element_type=jnp.float32)  # (rows, E)
        ctx3 = ctx3 + wj.reshape(tb, SEQ_LEN, EMB) * v3[:, j:j + 1, :]
    ctx = ctx3.reshape(rows, EMB)

    x = x + jnp.dot(ctx, wo_ref[...], preferred_element_type=jnp.float32) + bo_ref[...]

    # ---- LayerNorm2 (affine folded) + MLP (Linear -> exact GELU -> Linear), hidden chunked ----
    nx2 = _ln_normalize(x).astype(jnp.bfloat16)
    y = jnp.zeros((rows, EMB), jnp.float32)
    for lo in range(0, HIDDEN, MLP_CHUNK):                # 4 static chunks of 256
        h = jnp.dot(nx2, w1_ref[:, lo:lo + MLP_CHUNK],
                    preferred_element_type=jnp.float32) + b1_ref[:, lo:lo + MLP_CHUNK]
        h = _gelu_exact(h)
        y = y + jnp.dot(h.astype(jnp.bfloat16), w2_ref[lo:lo + MLP_CHUNK, :],
                        preferred_element_type=jnp.float32)

    o_ref[...] = x + y + b2_ref[...]                      # residual (dropout = identity in eval)


def transformer_block(x, params, *, batch_tile=128):
    """x: (B, S, E) float32. params: dict from init_params. batch_tile: sequences per block."""
    B, S, E = x.shape
    assert (S, E) == (SEQ_LEN, EMB)

    scale = 1.0 / math.sqrt(HEAD_DIM)
    g1 = params["ln1_g"].reshape(E)
    b1v = params["ln1_b"].reshape(1, E)
    g2 = params["ln2_g"].reshape(E)
    b2v = params["ln2_b"].reshape(1, E)

    # Fuse q/k/v weights; fold the attention scale into the q columns.
    wqkv = jnp.concatenate([params["wq"] * scale, params["wk"], params["wv"]], axis=1)
    bqkv = jnp.concatenate([params["bq"] * scale, params["bk"], params["bv"]], axis=1)
    # Fold LayerNorm1 affine into the QKV projection.
    wqkv_f = g1[:, None] * wqkv
    bqkv_f = b1v @ wqkv + bqkv
    # Fold LayerNorm2 affine into the first MLP linear; big MLP weights in bf16.
    w1_f = (g2[:, None] * params["w1"]).astype(jnp.bfloat16)
    b1_f = b2v @ params["w1"] + params["b1"]
    w2_b = params["w2"].astype(jnp.bfloat16)

    # One-hot head-segment matrices: seg[e, h] = 1 iff embedding lane e belongs to head h.
    seg = jnp.repeat(jnp.eye(HEADS, dtype=jnp.float32), HEAD_DIM, axis=0)   # (E, HEADS)
    segT = seg.T                                                            # (HEADS, E)

    weights = [wqkv_f, bqkv_f, params["wo"], params["bo"], seg, segT,
               w1_f, b1_f, w2_b, params["b2"]]

    # Batch tiling: TB sequences (TB*S rows) per grid step.
    TB = min(batch_tile, B)
    rows_tile = TB * S
    num_blocks = pl.cdiv(B, TB)
    rows_pad = num_blocks * rows_tile

    xf = x.reshape(B * S, E)
    if rows_pad != B * S:
        xf = jnp.pad(xf, ((0, rows_pad - B * S), (0, 0)))

    in_specs = [pl.BlockSpec((rows_tile, E), lambda b: (b, 0))]
    in_specs += [pl.BlockSpec(w.shape, lambda b: (0, 0)) for w in weights]

    out = pl.pallas_call(
        transformer_block_kernel,
        out_shape=jax.ShapeDtypeStruct((rows_pad, E), jnp.float32),
        grid=(num_blocks,),
        in_specs=in_specs,
        out_specs=pl.BlockSpec((rows_tile, E), lambda b: (b, 0)),
        compiler_params=pltpu.CompilerParams(
            dimension_semantics=("parallel",),          # shards batch blocks across TCs on v7x
            vmem_limit_bytes=32 * 1024 * 1024,          # safe on v5e/v6e/v7x; peak use ~10 MiB
        ),
    )(xf, *weights)

    return out[:B * S].reshape(B, S, E)


def init_params(key):
    ks = jax.random.split(key, 12)
    E, H = EMB, HIDDEN
    w = lambda k, shape, scale: (jax.random.normal(k, shape, jnp.float32) * scale)
    return dict(
        # LayerNorm params (PyTorch default init: gamma=1, beta=0)
        ln1_g=jnp.ones((1, E), jnp.float32), ln1_b=jnp.zeros((1, E), jnp.float32),
        ln2_g=jnp.ones((1, E), jnp.float32), ln2_b=jnp.zeros((1, E), jnp.float32),
        # attention in-proj (split into q/k/v) and out-proj
        wq=w(ks[0], (E, E), 0.1), bq=w(ks[1], (1, E), 0.02),
        wk=w(ks[2], (E, E), 0.1), bk=w(ks[3], (1, E), 0.02),
        wv=w(ks[4], (E, E), 0.1), bv=w(ks[5], (1, E), 0.02),
        wo=w(ks[6], (E, E), 0.1), bo=w(ks[7], (1, E), 0.02),
        # MLP: Linear(E, 32E) -> GELU -> Linear(32E, E)
        w1=w(ks[8], (E, H), 0.1), b1=w(ks[9], (1, H), 0.02),
        w2=w(ks[10], (H, E), 0.05), b2=w(ks[11], (1, E), 0.02),
    )


def transformer_block_ref(x, params):
    """Pure-JAX reference (mirrors the PyTorch block in eval mode)."""
    def ln(z, g, b):
        mu = z.mean(-1, keepdims=True)
        var = ((z - mu) ** 2).mean(-1, keepdims=True)
        return (z - mu) / jnp.sqrt(var + EPS) * g + b

    B, S, E = x.shape
    nx = ln(x, params["ln1_g"][0], params["ln1_b"][0])
    q = nx @ params["wq"] + params["bq"][0]
    k = nx @ params["wk"] + params["bk"][0]
    v = nx @ params["wv"] + params["bv"][0]
    q = q.reshape(B, S, HEADS, HEAD_DIM).transpose(0, 2, 1, 3)
    k = k.reshape(B, S, HEADS, HEAD_DIM).transpose(0, 2, 1, 3)
    v = v.reshape(B, S, HEADS, HEAD_DIM).transpose(0, 2, 1, 3)
    s = (q @ jnp.swapaxes(k, -1, -2)) / jnp.sqrt(jnp.float32(HEAD_DIM))
    mask = jnp.tril(jnp.ones((S, S), bool))
    s = jnp.where(mask, s, -jnp.inf)
    p = jax.nn.softmax(s, axis=-1)
    ctx = (p @ v).transpose(0, 2, 1, 3).reshape(B, S, E)
    attn = ctx @ params["wo"] + params["bo"][0]
    x = x + attn
    nx2 = ln(x, params["ln2_g"][0], params["ln2_b"][0])
    h = jax.nn.gelu(nx2 @ params["w1"] + params["b1"][0], approximate=False)
    return x + h @ params["w2"] + params["b2"][0]


if __name__ == "__main__":
    key = jax.random.PRNGKey(0)
    kx, kp = jax.random.split(key)
    params = init_params(kp)

    # Primary check: small batch, single grid block.
    B = 2
    x = jax.random.normal(kx, (B, SEQ_LEN, EMB), jnp.float32)
    fwd = jax.jit(transformer_block)
    out = jax.block_until_ready(fwd(x, params))
    assert out.shape == (B, SEQ_LEN, EMB) and out.dtype == jnp.float32
    assert bool(jnp.all(jnp.isfinite(out)))
    ref = transformer_block_ref(x, params)
    assert bool(jnp.allclose(out, ref, atol=5e-2, rtol=5e-2)), \
        f"max abs diff {float(jnp.max(jnp.abs(out - ref)))}"

    # Secondary check: exercise the grid loop + batch padding (B not divisible by batch_tile).
    B2 = 5
    x2 = jax.random.normal(jax.random.PRNGKey(1), (B2, SEQ_LEN, EMB), jnp.float32)
    out2 = jax.block_until_ready(
        jax.jit(lambda a, p: transformer_block(a, p, batch_tile=2))(x2, params))
    ref2 = transformer_block_ref(x2, params)
    assert out2.shape == (B2, SEQ_LEN, EMB)
    assert bool(jnp.allclose(out2, ref2, atol=5e-2, rtol=5e-2)), \
        f"max abs diff {float(jnp.max(jnp.abs(out2 - ref2)))}"

    print("KERNEL_OK")
</pallas_src>

<mosaic_0001>
module attributes {stable_mosaic.version = 11 : i64} {
  func.func @transformer_block_kernel(%arg0: i32, %arg1: memref<16x32xf32, #tpu.memory_space<vmem>>, %arg2: memref<32x96xf32, #tpu.memory_space<vmem>>, %arg3: memref<1x96xf32, #tpu.memory_space<vmem>>, %arg4: memref<32x32xf32, #tpu.memory_space<vmem>>, %arg5: memref<1x32xf32, #tpu.memory_space<vmem>>, %arg6: memref<32x4xf32, #tpu.memory_space<vmem>>, %arg7: memref<4x32xf32, #tpu.memory_space<vmem>>, %arg8: memref<32x1024xbf16, #tpu.memory_space<vmem>>, %arg9: memref<1x1024xf32, #tpu.memory_space<vmem>>, %arg10: memref<1024x32xbf16, #tpu.memory_space<vmem>>, %arg11: memref<1x32xf32, #tpu.memory_space<vmem>>, %arg12: memref<16x32xf32, #tpu.memory_space<vmem>>) attributes {dimension_semantics = [#tpu.dimension_semantics<parallel>], iteration_bounds = array<i64: 1>, scalar_prefetch = 0 : i64, scratch_operands = 0 : i64, tpu.core_type = #tpu.core_type<tc>, window_params = [{transform_indices = @transform_0, window_bounds = array<i64: 16, 32>}, {pipeline_mode = #tpu.pipeline_mode<synchronous>, transform_indices = @transform_1, window_bounds = array<i64: 32, 96>}, {pipeline_mode = #tpu.pipeline_mode<synchronous>, transform_indices = @transform_2, window_bounds = array<i64: 1, 96>}, {pipeline_mode = #tpu.pipeline_mode<synchronous>, transform_indices = @transform_3, window_bounds = array<i64: 32, 32>}, {pipeline_mode = #tpu.pipeline_mode<synchronous>, transform_indices = @transform_4, window_bounds = array<i64: 1, 32>}, {pipeline_mode = #tpu.pipeline_mode<synchronous>, transform_indices = @transform_5, window_bounds = array<i64: 32, 4>}, {pipeline_mode = #tpu.pipeline_mode<synchronous>, transform_indices = @transform_6, window_bounds = array<i64: 4, 32>}, {pipeline_mode = #tpu.pipeline_mode<synchronous>, transform_indices = @transform_7, window_bounds = array<i64: 32, 1024>}, {pipeline_mode = #tpu.pipeline_mode<synchronous>, transform_indices = @transform_8, window_bounds = array<i64: 1, 1024>}, {pipeline_mode = #tpu.pipeline_mode<synchronous>, transform_indices = @transform_9, window_bounds = array<i64: 1024, 32>}, {pipeline_mode = #tpu.pipeline_mode<synchronous>, transform_indices = @transform_10, window_bounds = array<i64: 1, 32>}, {transform_indices = @transform_11, window_bounds = array<i64: 16, 32>}]} {
    %c0 = arith.constant 0 : index
    %c0_0 = arith.constant 0 : index
    %0 = vector.load %arg1[%c0, %c0_0] : memref<16x32xf32, #tpu.memory_space<vmem>>, vector<16x32xf32>
    %cst = arith.constant dense<0.000000e+00> : vector<16xf32>
    %1 = vector.multi_reduction <add>, %0, %cst [1] : vector<16x32xf32> to vector<16xf32>
    %2 = vector.shape_cast %1 : vector<16xf32> to vector<16x1xf32>
    %cst_1 = arith.constant 3.200000e+01 : f32
    %3 = vector.broadcast %cst_1 : f32 to vector<16x1xf32>
    %4 = arith.divf %2, %3 : vector<16x1xf32>
    %5 = vector.broadcast %4 : vector<16x1xf32> to vector<16x32xf32>
    %6 = arith.subf %0, %5 : vector<16x32xf32>
    %7 = arith.mulf %6, %6 : vector<16x32xf32>
    %cst_2 = arith.constant dense<0.000000e+00> : vector<16xf32>
    %8 = vector.multi_reduction <add>, %7, %cst_2 [1] : vector<16x32xf32> to vector<16xf32>
    %9 = vector.shape_cast %8 : vector<16xf32> to vector<16x1xf32>
    %cst_3 = arith.constant 3.200000e+01 : f32
    %10 = vector.broadcast %cst_3 : f32 to vector<16x1xf32>
    %11 = arith.divf %9, %10 : vector<16x1xf32>
    %cst_4 = arith.constant 9.99999974E-6 : f32
    %12 = vector.broadcast %cst_4 : f32 to vector<16x1xf32>
    %13 = arith.addf %11, %12 : vector<16x1xf32>
    %14 = math.rsqrt %13 : vector<16x1xf32>
    %15 = vector.broadcast %14 : vector<16x1xf32> to vector<16x32xf32>
    %16 = arith.mulf %6, %15 : vector<16x32xf32>
    %c0_5 = arith.constant 0 : index
    %c0_6 = arith.constant 0 : index
    %17 = vector.load %arg2[%c0_5, %c0_6] : memref<32x96xf32, #tpu.memory_space<vmem>>, vector<32x96xf32>
    %cst_7 = arith.constant dense<0.000000e+00> : vector<16x96xf32>
    %18 = tpu.matmul %16, %17, %cst_7 {dimension_numbers = #tpu.dot_dimension_numbers<[1], [0], [0], [1], [0, 0, 1, 1], [], []>} : vector<16x32xf32>, vector<32x96xf32>, vector<16x96xf32> -> vector<16x96xf32>
    %c0_8 = arith.constant 0 : index
    %c0_9 = arith.constant 0 : index
    %19 = vector.load %arg3[%c0_8, %c0_9] : memref<1x96xf32, #tpu.memory_space<vmem>>, vector<1x96xf32>
    %20 = vector.broadcast %19 : vector<1x96xf32> to vector<16x96xf32>
    %21 = arith.addf %18, %20 : vector<16x96xf32>
    %22 = vector.extract_strided_slice %21 {offsets = [0, 0], sizes = [16, 32], strides = [1, 1]} : vector<16x96xf32> to vector<16x32xf32>
    %23 = vector.shape_cast %22 : vector<16x32xf32> to vector<2x8x32xf32>
    %24 = vector.extract_strided_slice %21 {offsets = [0, 32], sizes = [16, 32], strides = [1, 1]} : vector<16x96xf32> to vector<16x32xf32>
    %25 = vector.shape_cast %24 : vector<16x32xf32> to vector<2x8x32xf32>
    %26 = vector.extract_strided_slice %21 {offsets = [0, 64], sizes = [16, 32], strides = [1, 1]} : vector<16x96xf32> to vector<16x32xf32>
    %27 = vector.shape_cast %26 : vector<16x32xf32> to vector<2x8x32xf32>
    %c0_10 = arith.constant 0 : index
    %c0_11 = arith.constant 0 : index
    %28 = vector.load %arg6[%c0_10, %c0_11] : memref<32x4xf32, #tpu.memory_space<vmem>>, vector<32x4xf32>
    %c0_12 = arith.constant 0 : index
    %c0_13 = arith.constant 0 : index
    %29 = vector.load %arg7[%c0_12, %c0_13] : memref<4x32xf32, #tpu.memory_space<vmem>>, vector<4x32xf32>
    %30 = tpu.iota {dimensions = array<i32: 0>} : vector<16x1xi32>
    %c7_i32 = arith.constant 7 : i32
    %31 = vector.broadcast %c7_i32 : i32 to vector<16x1xi32>
    %32 = arith.andi %30, %31 : vector<16x1xi32>
    %33 = vector.extract_strided_slice %25 {offsets = [0, 0, 0], sizes = [2, 1, 32], strides = [1, 1, 1]} : vector<2x8x32xf32> to vector<2x1x32xf32>
    %34 = vector.broadcast %33 : vector<2x1x32xf32> to vector<2x8x32xf32>
    %35 = arith.mulf %23, %34 : vector<2x8x32xf32>
    %36 = vector.shape_cast %35 : vector<2x8x32xf32> to vector<16x32xf32>
    %cst_14 = arith.constant dense<0.000000e+00> : vector<16x4xf32>
    %37 = tpu.matmul %36, %28, %cst_14 {dimension_numbers = #tpu.dot_dimension_numbers<[1], [0], [0], [1], [0, 0, 1, 1], [], []>} : vector<16x32xf32>, vector<32x4xf32>, vector<16x4xf32> -> vector<16x4xf32>
    %c0_i32 = arith.constant 0 : i32
    %38 = vector.broadcast %c0_i32 : i32 to vector<16x1xi32>
    %39 = arith.cmpi sge, %32, %38 : vector<16x1xi32>
    %cst_15 = arith.constant -1.000000e+30 : f32
    %40 = vector.shape_cast %39 : vector<16x1xi1> to vector<16x1xi1>
    %41 = vector.broadcast %40 : vector<16x1xi1> to vector<16x4xi1>
    %42 = vector.broadcast %cst_15 : f32 to vector<16x4xf32>
    %43 = arith.select %41, %37, %42 : vector<16x4xi1>, vector<16x4xf32>
    %44 = vector.extract_strided_slice %25 {offsets = [0, 1, 0], sizes = [2, 1, 32], strides = [1, 1, 1]} : vector<2x8x32xf32> to vector<2x1x32xf32>
    %45 = vector.broadcast %44 : vector<2x1x32xf32> to vector<2x8x32xf32>
    %46 = arith.mulf %23, %45 : vector<2x8x32xf32>
    %47 = vector.shape_cast %46 : vector<2x8x32xf32> to vector<16x32xf32>
    %cst_16 = arith.constant dense<0.000000e+00> : vector<16x4xf32>
    %48 = tpu.matmul %47, %28, %cst_16 {dimension_numbers = #tpu.dot_dimension_numbers<[1], [0], [0], [1], [0, 0, 1, 1], [], []>} : vector<16x32xf32>, vector<32x4xf32>, vector<16x4xf32> -> vector<16x4xf32>
    %c1_i32 = arith.constant 1 : i32
    %49 = vector.broadcast %c1_i32 : i32 to vector<16x1xi32>
    %50 = arith.cmpi sge, %32, %49 : vector<16x1xi32>
    %cst_17 = arith.constant -1.000000e+30 : f32
    %51 = vector.shape_cast %50 : vector<16x1xi1> to vector<16x1xi1>
    %52 = vector.broadcast %51 : vector<16x1xi1> to vector<16x4xi1>
    %53 = vector.broadcast %cst_17 : f32 to vector<16x4xf32>
    %54 = arith.select %52, %48, %53 : vector<16x4xi1>, vector<16x4xf32>
    %55 = vector.extract_strided_slice %25 {offsets = [0, 2, 0], sizes = [2, 1, 32], strides = [1, 1, 1]} : vector<2x8x32xf32> to vector<2x1x32xf32>
    %56 = vector.broadcast %55 : vector<2x1x32xf32> to vector<2x8x32xf32>
    %57 = arith.mulf %23, %56 : vector<2x8x32xf32>
    %58 = vector.shape_cast %57 : vector<2x8x32xf32> to vector<16x32xf32>
    %cst_18 = arith.constant dense<0.000000e+00> : vector<16x4xf32>
    %59 = tpu.matmul %58, %28, %cst_18 {dimension_numbers = #tpu.dot_dimension_numbers<[1], [0], [0], [1], [0, 0, 1, 1], [], []>} : vector<16x32xf32>, vector<32x4xf32>, vector<16x4xf32> -> vector<16x4xf32>
    %c2_i32 = arith.constant 2 : i32
    %60 = vector.broadcast %c2_i32 : i32 to vector<16x1xi32>
    %61 = arith.cmpi sge, %32, %60 : vector<16x1xi32>
    %cst_19 = arith.constant -1.000000e+30 : f32
    %62 = vector.shape_cast %61 : vector<16x1xi1> to vector<16x1xi1>
    %63 = vector.broadcast %62 : vector<16x1xi1> to vector<16x4xi1>
    %64 = vector.broadcast %cst_19 : f32 to vector<16x4xf32>
    %65 = arith.select %63, %59, %64 : vector<16x4xi1>, vector<16x4xf32>
    %66 = vector.extract_strided_slice %25 {offsets = [0, 3, 0], sizes = [2, 1, 32], strides = [1, 1, 1]} : vector<2x8x32xf32> to vector<2x1x32xf32>
    %67 = vector.broadcast %66 : vector<2x1x32xf32> to vector<2x8x32xf32>
    %68 = arith.mulf %23, %67 : vector<2x8x32xf32>
    %69 = vector.shape_cast %68 : vector<2x8x32xf32> to vector<16x32xf32>
    %cst_20 = arith.constant dense<0.000000e+00> : vector<16x4xf32>
    %70 = tpu.matmul %69, %28, %cst_20 {dimension_numbers = #tpu.dot_dimension_numbers<[1], [0], [0], [1], [0, 0, 1, 1], [], []>} : vector<16x32xf32>, vector<32x4xf32>, vector<16x4xf32> -> vector<16x4xf32>
    %c3_i32 = arith.constant 3 : i32
    %71 = vector.broadcast %c3_i32 : i32 to vector<16x1xi32>
    %72 = arith.cmpi sge, %32, %71 : vector<16x1xi32>
    %cst_21 = arith.constant -1.000000e+30 : f32
    %73 = vector.shape_cast %72 : vector<16x1xi1> to vector<16x1xi1>
    %74 = vector.broadcast %73 : vector<16x1xi1> to vector<16x4xi1>
    %75 = vector.broadcast %cst_21 : f32 to vector<16x4xf32>
    %76 = arith.select %74, %70, %75 : vector<16x4xi1>, vector<16x4xf32>
    %77 = vector.extract_strided_slice %25 {offsets = [0, 4, 0], sizes = [2, 1, 32], strides = [1, 1, 1]} : vector<2x8x32xf32> to vector<2x1x32xf32>
    %78 = vector.broadcast %77 : vector<2x1x32xf32> to vector<2x8x32xf32>
    %79 = arith.mulf %23, %78 : vector<2x8x32xf32>
    %80 = vector.shape_cast %79 : vector<2x8x32xf32> to vector<16x32xf32>
    %cst_22 = arith.constant dense<0.000000e+00> : vector<16x4xf32>
    %81 = tpu.matmul %80, %28, %cst_22 {dimension_numbers = #tpu.dot_dimension_numbers<[1], [0], [0], [1], [0, 0, 1, 1], [], []>} : vector<16x32xf32>, vector<32x4xf32>, vector<16x4xf32> -> vector<16x4xf32>
    %c4_i32 = arith.constant 4 : i32
    %82 = vector.broadcast %c4_i32 : i32 to vector<16x1xi32>
    %83 = arith.cmpi sge, %32, %82 : vector<16x1xi32>
    %cst_23 = arith.constant -1.000000e+30 : f32
    %84 = vector.shape_cast %83 : vector<16x1xi1> to vector<16x1xi1>
    %85 = vector.broadcast %84 : vector<16x1xi1> to vector<16x4xi1>
    %86 = vector.broadcast %cst_23 : f32 to vector<16x4xf32>
    %87 = arith.select %85, %81, %86 : vector<16x4xi1>, vector<16x4xf32>
    %88 = vector.extract_strided_slice %25 {offsets = [0, 5, 0], sizes = [2, 1, 32], strides = [1, 1, 1]} : vector<2x8x32xf32> to vector<2x1x32xf32>
    %89 = vector.broadcast %88 : vector<2x1x32xf32> to vector<2x8x32xf32>
    %90 = arith.mulf %23, %89 : vector<2x8x32xf32>
    %91 = vector.shape_cast %90 : vector<2x8x32xf32> to vector<16x32xf32>
    %cst_24 = arith.constant dense<0.000000e+00> : vector<16x4xf32>
    %92 = tpu.matmul %91, %28, %cst_24 {dimension_numbers = #tpu.dot_dimension_numbers<[1], [0], [0], [1], [0, 0, 1, 1], [], []>} : vector<16x32xf32>, vector<32x4xf32>, vector<16x4xf32> -> vector<16x4xf32>
    %c5_i32 = arith.constant 5 : i32
    %93 = vector.broadcast %c5_i32 : i32 to vector<16x1xi32>
    %94 = arith.cmpi sge, %32, %93 : vector<16x1xi32>
    %cst_25 = arith.constant -1.000000e+30 : f32
    %95 = vector.shape_cast %94 : vector<16x1xi1> to vector<16x1xi1>
    %96 = vector.broadcast %95 : vector<16x1xi1> to vector<16x4xi1>
    %97 = vector.broadcast %cst_25 : f32 to vector<16x4xf32>
    %98 = arith.select %96, %92, %97 : vector<16x4xi1>, vector<16x4xf32>
    %99 = vector.extract_strided_slice %25 {offsets = [0, 6, 0], sizes = [2, 1, 32], strides = [1, 1, 1]} : vector<2x8x32xf32> to vector<2x1x32xf32>
    %100 = vector.broadcast %99 : vector<2x1x32xf32> to vector<2x8x32xf32>
    %101 = arith.mulf %23, %100 : vector<2x8x32xf32>
    %102 = vector.shape_cast %101 : vector<2x8x32xf32> to vector<16x32xf32>
    %cst_26 = arith.constant dense<0.000000e+00> : vector<16x4xf32>
    %103 = tpu.matmul %102, %28, %cst_26 {dimension_numbers = #tpu.dot_dimension_numbers<[1], [0], [0], [1], [0, 0, 1, 1], [], []>} : vector<16x32xf32>, vector<32x4xf32>, vector<16x4xf32> -> vector<16x4xf32>
    %c6_i32 = arith.constant 6 : i32
    %104 = vector.broadcast %c6_i32 : i32 to vector<16x1xi32>
    %105 = arith.cmpi sge, %32, %104 : vector<16x1xi32>
    %cst_27 = arith.constant -1.000000e+30 : f32
    %106 = vector.shape_cast %105 : vector<16x1xi1> to vector<16x1xi1>
    %107 = vector.broadcast %106 : vector<16x1xi1> to vector<16x4xi1>
    %108 = vector.broadcast %cst_27 : f32 to vector<16x4xf32>
    %109 = arith.select %107, %103, %108 : vector<16x4xi1>, vector<16x4xf32>
    %110 = vector.extract_strided_slice %25 {offsets = [0, 7, 0], sizes = [2, 1, 32], strides = [1, 1, 1]} : vector<2x8x32xf32> to vector<2x1x32xf32>
    %111 = vector.broadcast %110 : vector<2x1x32xf32> to vector<2x8x32xf32>
    %112 = arith.mulf %23, %111 : vector<2x8x32xf32>
    %113 = vector.shape_cast %112 : vector<2x8x32xf32> to vector<16x32xf32>
    %cst_28 = arith.constant dense<0.000000e+00> : vector<16x4xf32>
    %114 = tpu.matmul %113, %28, %cst_28 {dimension_numbers = #tpu.dot_dimension_numbers<[1], [0], [0], [1], [0, 0, 1, 1], [], []>} : vector<16x32xf32>, vector<32x4xf32>, vector<16x4xf32> -> vector<16x4xf32>
    %c7_i32_29 = arith.constant 7 : i32
    %115 = vector.broadcast %c7_i32_29 : i32 to vector<16x1xi32>
    %116 = arith.cmpi sge, %32, %115 : vector<16x1xi32>
    %cst_30 = arith.constant -1.000000e+30 : f32
    %117 = vector.shape_cast %116 : vector<16x1xi1> to vector<16x1xi1>
    %118 = vector.broadcast %117 : vector<16x1xi1> to vector<16x4xi1>
    %119 = vector.broadcast %cst_30 : f32 to vector<16x4xf32>
    %120 = arith.select %118, %114, %119 : vector<16x4xi1>, vector<16x4xf32>
    %121 = vector.shape_cast %43 : vector<16x4xf32> to vector<1x16x4xf32>
    %122 = vector.shape_cast %54 : vector<16x4xf32> to vector<1x16x4xf32>
    %123 = vector.shape_cast %65 : vector<16x4xf32> to vector<1x16x4xf32>
    %124 = vector.shape_cast %76 : vector<16x4xf32> to vector<1x16x4xf32>
    %125 = vector.shape_cast %87 : vector<16x4xf32> to vector<1x16x4xf32>
    %126 = vector.shape_cast %98 : vector<16x4xf32> to vector<1x16x4xf32>
    %127 = vector.shape_cast %109 : vector<16x4xf32> to vector<1x16x4xf32>
    %128 = vector.shape_cast %120 : vector<16x4xf32> to vector<1x16x4xf32>
    %129 = tpu.concatenate %121, %122, %123, %124, %125, %126, %127, %128 in 0 : vector<1x16x4xf32>, vector<1x16x4xf32>, vector<1x16x4xf32>, vector<1x16x4xf32>, vector<1x16x4xf32>, vector<1x16x4xf32>, vector<1x16x4xf32>, vector<1x16x4xf32> -> vector<8x16x4xf32>
    %cst_31 = arith.constant dense<0xFF800000> : vector<16x4xf32>
    %130 = vector.multi_reduction <maximumf>, %129, %cst_31 [0] : vector<8x16x4xf32> to vector<16x4xf32>
    %131 = vector.shape_cast %130 : vector<16x4xf32> to vector<1x16x4xf32>
    %132 = vector.broadcast %131 : vector<1x16x4xf32> to vector<8x16x4xf32>
    %133 = arith.subf %129, %132 : vector<8x16x4xf32>
    %134 = math.exp %133 : vector<8x16x4xf32>
    %cst_32 = arith.constant dense<0.000000e+00> : vector<16x4xf32>
    %135 = vector.multi_reduction <add>, %134, %cst_32 [0] : vector<8x16x4xf32> to vector<16x4xf32>
    %136 = tpu.reciprocal %135 {approx = true} : vector<16x4xf32> -> vector<16x4xf32>
    %cst_33 = arith.constant 0.000000e+00 : f32
    %137 = vector.broadcast %cst_33 : f32 to vector<2x8x32xf32>
    %138 = vector.extract_strided_slice %134 {offsets = [0, 0, 0], sizes = [1, 16, 4], strides = [1, 1, 1]} : vector<8x16x4xf32> to vector<1x16x4xf32>
    %139 = vector.shape_cast %138 : vector<1x16x4xf32> to vector<16x4xf32>
    %140 = arith.mulf %139, %136 : vector<16x4xf32>
    %cst_34 = arith.constant dense<0.000000e+00> : vector<16x32xf32>
    %141 = tpu.matmul %140, %29, %cst_34 {dimension_numbers = #tpu.dot_dimension_numbers<[1], [0], [0], [1], [0, 0, 1, 1], [], []>} : vector<16x4xf32>, vector<4x32xf32>, vector<16x32xf32> -> vector<16x32xf32>
    %142 = vector.shape_cast %141 : vector<16x32xf32> to vector<2x8x32xf32>
    %143 = vector.extract_strided_slice %27 {offsets = [0, 0, 0], sizes = [2, 1, 32], strides = [1, 1, 1]} : vector<2x8x32xf32> to vector<2x1x32xf32>
    %144 = vector.broadcast %143 : vector<2x1x32xf32> to vector<2x8x32xf32>
    %145 = arith.mulf %142, %144 : vector<2x8x32xf32>
    %146 = arith.addf %137, %145 : vector<2x8x32xf32>
    %147 = vector.extract_strided_slice %134 {offsets = [1, 0, 0], sizes = [1, 16, 4], strides = [1, 1, 1]} : vector<8x16x4xf32> to vector<1x16x4xf32>
    %148 = vector.shape_cast %147 : vector<1x16x4xf32> to vector<16x4xf32>
    %149 = arith.mulf %148, %136 : vector<16x4xf32>
    %cst_35 = arith.constant dense<0.000000e+00> : vector<16x32xf32>
    %150 = tpu.matmul %149, %29, %cst_35 {dimension_numbers = #tpu.dot_dimension_numbers<[1], [0], [0], [1], [0, 0, 1, 1], [], []>} : vector<16x4xf32>, vector<4x32xf32>, vector<16x32xf32> -> vector<16x32xf32>
    %151 = vector.shape_cast %150 : vector<16x32xf32> to vector<2x8x32xf32>
    %152 = vector.extract_strided_slice %27 {offsets = [0, 1, 0], sizes = [2, 1, 32], strides = [1, 1, 1]} : vector<2x8x32xf32> to vector<2x1x32xf32>
    %153 = vector.broadcast %152 : vector<2x1x32xf32> to vector<2x8x32xf32>
    %154 = arith.mulf %151, %153 : vector<2x8x32xf32>
    %155 = arith.addf %146, %154 : vector<2x8x32xf32>
    %156 = vector.extract_strided_slice %134 {offsets = [2, 0, 0], sizes = [1, 16, 4], strides = [1, 1, 1]} : vector<8x16x4xf32> to vector<1x16x4xf32>
    %157 = vector.shape_cast %156 : vector<1x16x4xf32> to vector<16x4xf32>
    %158 = arith.mulf %157, %136 : vector<16x4xf32>
    %cst_36 = arith.constant dense<0.000000e+00> : vector<16x32xf32>
    %159 = tpu.matmul %158, %29, %cst_36 {dimension_numbers = #tpu.dot_dimension_numbers<[1], [0], [0], [1], [0, 0, 1, 1], [], []>} : vector<16x4xf32>, vector<4x32xf32>, vector<16x32xf32> -> vector<16x32xf32>
    %160 = vector.shape_cast %159 : vector<16x32xf32> to vector<2x8x32xf32>
    %161 = vector.extract_strided_slice %27 {offsets = [0, 2, 0], sizes = [2, 1, 32], strides = [1, 1, 1]} : vector<2x8x32xf32> to vector<2x1x32xf32>
    %162 = vector.broadcast %161 : vector<2x1x32xf32> to vector<2x8x32xf32>
    %163 = arith.mulf %160, %162 : vector<2x8x32xf32>
    %164 = arith.addf %155, %163 : vector<2x8x32xf32>
    %165 = vector.extract_strided_slice %134 {offsets = [3, 0, 0], sizes = [1, 16, 4], strides = [1, 1, 1]} : vector<8x16x4xf32> to vector<1x16x4xf32>
    %166 = vector.shape_cast %165 : vector<1x16x4xf32> to vector<16x4xf32>
    %167 = arith.mulf %166, %136 : vector<16x4xf32>
    %cst_37 = arith.constant dense<0.000000e+00> : vector<16x32xf32>
    %168 = tpu.matmul %167, %29, %cst_37 {dimension_numbers = #tpu.dot_dimension_numbers<[1], [0], [0], [1], [0, 0, 1, 1], [], []>} : vector<16x4xf32>, vector<4x32xf32>, vector<16x32xf32> -> vector<16x32xf32>
    %169 = vector.shape_cast %168 : vector<16x32xf32> to vector<2x8x32xf32>
    %170 = vector.extract_strided_slice %27 {offsets = [0, 3, 0], sizes = [2, 1, 32], strides = [1, 1, 1]} : vector<2x8x32xf32> to vector<2x1x32xf32>
    %171 = vector.broadcast %170 : vector<2x1x32xf32> to vector<2x8x32xf32>
    %172 = arith.mulf %169, %171 : vector<2x8x32xf32>
    %173 = arith.addf %164, %172 : vector<2x8x32xf32>
    %174 = vector.extract_strided_slice %134 {offsets = [4, 0, 0], sizes = [1, 16, 4], strides = [1, 1, 1]} : vector<8x16x4xf32> to vector<1x16x4xf32>
    %175 = vector.shape_cast %174 : vector<1x16x4xf32> to vector<16x4xf32>
    %176 = arith.mulf %175, %136 : vector<16x4xf32>
    %cst_38 = arith.constant dense<0.000000e+00> : vector<16x32xf32>
    %177 = tpu.matmul %176, %29, %cst_38 {dimension_numbers = #tpu.dot_dimension_numbers<[1], [0], [0], [1], [0, 0, 1, 1], [], []>} : vector<16x4xf32>, vector<4x32xf32>, vector<16x32xf32> -> vector<16x32xf32>
    %178 = vector.shape_cast %177 : vector<16x32xf32> to vector<2x8x32xf32>
    %179 = vector.extract_strided_slice %27 {offsets = [0, 4, 0], sizes = [2, 1, 32], strides = [1, 1, 1]} : vector<2x8x32xf32> to vector<2x1x32xf32>
    %180 = vector.broadcast %179 : vector<2x1x32xf32> to vector<2x8x32xf32>
    %181 = arith.mulf %178, %180 : vector<2x8x32xf32>
    %182 = arith.addf %173, %181 : vector<2x8x32xf32>
    %183 = vector.extract_strided_slice %134 {offsets = [5, 0, 0], sizes = [1, 16, 4], strides = [1, 1, 1]} : vector<8x16x4xf32> to vector<1x16x4xf32>
    %184 = vector.shape_cast %183 : vector<1x16x4xf32> to vector<16x4xf32>
    %185 = arith.mulf %184, %136 : vector<16x4xf32>
    %cst_39 = arith.constant dense<0.000000e+00> : vector<16x32xf32>
    %186 = tpu.matmul %185, %29, %cst_39 {dimension_numbers = #tpu.dot_dimension_numbers<[1], [0], [0], [1], [0, 0, 1, 1], [], []>} : vector<16x4xf32>, vector<4x32xf32>, vector<16x32xf32> -> vector<16x32xf32>
    %187 = vector.shape_cast %186 : vector<16x32xf32> to vector<2x8x32xf32>
    %188 = vector.extract_strided_slice %27 {offsets = [0, 5, 0], sizes = [2, 1, 32], strides = [1, 1, 1]} : vector<2x8x32xf32> to vector<2x1x32xf32>
    %189 = vector.broadcast %188 : vector<2x1x32xf32> to vector<2x8x32xf32>
    %190 = arith.mulf %187, %189 : vector<2x8x32xf32>
    %191 = arith.addf %182, %190 : vector<2x8x32xf32>
    %192 = vector.extract_strided_slice %134 {offsets = [6, 0, 0], sizes = [1, 16, 4], strides = [1, 1, 1]} : vector<8x16x4xf32> to vector<1x16x4xf32>
    %193 = vector.shape_cast %192 : vector<1x16x4xf32> to vector<16x4xf32>
    %194 = arith.mulf %193, %136 : vector<16x4xf32>
    %cst_40 = arith.constant dense<0.000000e+00> : vector<16x32xf32>
    %195 = tpu.matmul %194, %29, %cst_40 {dimension_numbers = #tpu.dot_dimension_numbers<[1], [0], [0], [1], [0, 0, 1, 1], [], []>} : vector<16x4xf32>, vector<4x32xf32>, vector<16x32xf32> -> vector<16x32xf32>
    %196 = vector.shape_cast %195 : vector<16x32xf32> to vector<2x8x32xf32>
    %197 = vector.extract_strided_slice %27 {offsets = [0, 6, 0], sizes = [2, 1, 32], strides = [1, 1, 1]} : vector<2x8x32xf32> to vector<2x1x32xf32>
    %198 = vector.broadcast %197 : vector<2x1x32xf32> to vector<2x8x32xf32>
    %199 = arith.mulf %196, %198 : vector<2x8x32xf32>
    %200 = arith.addf %191, %199 : vector<2x8x32xf32>
    %201 = vector.extract_strided_slice %134 {offsets = [7, 0, 0], sizes = [1, 16, 4], strides = [1, 1, 1]} : vector<8x16x4xf32> to vector<1x16x4xf32>
    %202 = vector.shape_cast %201 : vector<1x16x4xf32> to vector<16x4xf32>
    %203 = arith.mulf %202, %136 : vector<16x4xf32>
    %cst_41 = arith.constant dense<0.000000e+00> : vector<16x32xf32>
    %204 = tpu.matmul %203, %29, %cst_41 {dimension_numbers = #tpu.dot_dimension_numbers<[1], [0], [0], [1], [0, 0, 1, 1], [], []>} : vector<16x4xf32>, vector<4x32xf32>, vector<16x32xf32> -> vector<16x32xf32>
    %205 = vector.shape_cast %204 : vector<16x32xf32> to vector<2x8x32xf32>
    %206 = vector.extract_strided_slice %27 {offsets = [0, 7, 0], sizes = [2, 1, 32], strides = [1, 1, 1]} : vector<2x8x32xf32> to vector<2x1x32xf32>
    %207 = vector.broadcast %206 : vector<2x1x32xf32> to vector<2x8x32xf32>
    %208 = arith.mulf %205, %207 : vector<2x8x32xf32>
    %209 = arith.addf %200, %208 : vector<2x8x32xf32>
    %210 = vector.shape_cast %209 : vector<2x8x32xf32> to vector<16x32xf32>
    %c0_42 = arith.constant 0 : index
    %c0_43 = arith.constant 0 : index
    %211 = vector.load %arg4[%c0_42, %c0_43] : memref<32x32xf32, #tpu.memory_space<vmem>>, vector<32x32xf32>
    %cst_44 = arith.constant dense<0.000000e+00> : vector<16x32xf32>
    %212 = tpu.matmul %210, %211, %cst_44 {dimension_numbers = #tpu.dot_dimension_numbers<[1], [0], [0], [1], [0, 0, 1, 1], [], []>} : vector<16x32xf32>, vector<32x32xf32>, vector<16x32xf32> -> vector<16x32xf32>
    %213 = arith.addf %0, %212 : vector<16x32xf32>
    %c0_45 = arith.constant 0 : index
    %c0_46 = arith.constant 0 : index
    %214 = vector.load %arg5[%c0_45, %c0_46] : memref<1x32xf32, #tpu.memory_space<vmem>>, vector<1x32xf32>
    %215 = vector.broadcast %214 : vector<1x32xf32> to vector<16x32xf32>
    %216 = arith.addf %213, %215 : vector<16x32xf32>
    %cst_47 = arith.constant dense<0.000000e+00> : vector<16xf32>
    %217 = vector.multi_reduction <add>, %216, %cst_47 [1] : vector<16x32xf32> to vector<16xf32>
    %218 = vector.shape_cast %217 : vector<16xf32> to vector<16x1xf32>
    %cst_48 = arith.constant 3.200000e+01 : f32
    %219 = vector.broadcast %cst_48 : f32 to vector<16x1xf32>
    %220 = arith.divf %218, %219 : vector<16x1xf32>
    %221 = vector.broadcast %220 : vector<16x1xf32> to vector<16x32xf32>
    %222 = arith.subf %216, %221 : vector<16x32xf32>
    %223 = arith.mulf %222, %222 : vector<16x32xf32>
    %cst_49 = arith.constant dense<0.000000e+00> : vector<16xf32>
    %224 = vector.multi_reduction <add>, %223, %cst_49 [1] : vector<16x32xf32> to vector<16xf32>
    %225 = vector.shape_cast %224 : vector<16xf32> to vector<16x1xf32>
    %cst_50 = arith.constant 3.200000e+01 : f32
    %226 = vector.broadcast %cst_50 : f32 to vector<16x1xf32>
    %227 = arith.divf %225, %226 : vector<16x1xf32>
    %cst_51 = arith.constant 9.99999974E-6 : f32
    %228 = vector.broadcast %cst_51 : f32 to vector<16x1xf32>
    %229 = arith.addf %227, %228 : vector<16x1xf32>
    %230 = math.rsqrt %229 : vector<16x1xf32>
    %231 = vector.broadcast %230 : vector<16x1xf32> to vector<16x32xf32>
    %232 = arith.mulf %222, %231 : vector<16x32xf32>
    %233 = arith.truncf %232 : vector<16x32xf32> to vector<16x32xbf16>
    %cst_52 = arith.constant 0.000000e+00 : f32
    %234 = vector.broadcast %cst_52 : f32 to vector<16x32xf32>
    %c0_53 = arith.constant 0 : index
    %c0_54 = arith.constant 0 : index
    %235 = vector.load %arg8[%c0_53, %c0_54] : memref<32x1024xbf16, #tpu.memory_space<vmem>>, vector<32x256xbf16>
    %cst_55 = arith.constant dense<0.000000e+00> : vector<16x256xf32>
    %236 = tpu.matmul %233, %235, %cst_55 {dimension_numbers = #tpu.dot_dimension_numbers<[1], [0], [0], [1], [0, 0, 1, 1], [], []>} : vector<16x32xbf16>, vector<32x256xbf16>, vector<16x256xf32> -> vector<16x256xf32>
    %c0_56 = arith.constant 0 : index
    %c0_57 = arith.constant 0 : index
    %237 = vector.load %arg9[%c0_56, %c0_57] : memref<1x1024xf32, #tpu.memory_space<vmem>>, vector<1x256xf32>
    %238 = vector.broadcast %237 : vector<1x256xf32> to vector<16x256xf32>
    %239 = arith.addf %236, %238 : vector<16x256xf32>
    %240 = math.absf %239 : vector<16x256xf32>
    %cst_58 = arith.constant 0.707106769 : f32
    %241 = vector.broadcast %cst_58 : f32 to vector<16x256xf32>
    %242 = arith.mulf %240, %241 : vector<16x256xf32>
    %cst_59 = arith.constant 0.327591091 : f32
    %243 = vector.broadcast %cst_59 : f32 to vector<16x256xf32>
    %244 = arith.mulf %243, %242 : vector<16x256xf32>
    %cst_60 = arith.constant 1.000000e+00 : f32
    %245 = vector.broadcast %cst_60 : f32 to vector<16x256xf32>
    %246 = arith.addf %245, %244 : vector<16x256xf32>
    %247 = tpu.reciprocal %246 {approx = true} : vector<16x256xf32> -> vector<16x256xf32>
    %cst_61 = arith.constant 1.06140542 : f32
    %248 = vector.broadcast %cst_61 : f32 to vector<16x256xf32>
    %249 = arith.mulf %248, %247 : vector<16x256xf32>
    %cst_62 = arith.constant -1.45315206 : f32
    %250 = vector.broadcast %cst_62 : f32 to vector<16x256xf32>
    %251 = arith.addf %249, %250 : vector<16x256xf32>
    %252 = arith.mulf %251, %247 : vector<16x256xf32>
    %cst_63 = arith.constant 1.42141378 : f32
    %253 = vector.broadcast %cst_63 : f32 to vector<16x256xf32>
    %254 = arith.addf %252, %253 : vector<16x256xf32>
    %255 = arith.mulf %254, %247 : vector<16x256xf32>
    %cst_64 = arith.constant -0.284496725 : f32
    %256 = vector.broadcast %cst_64 : f32 to vector<16x256xf32>
    %257 = arith.addf %255, %256 : vector<16x256xf32>
    %258 = arith.mulf %257, %247 : vector<16x256xf32>
    %cst_65 = arith.constant 0.254829586 : f32
    %259 = vector.broadcast %cst_65 : f32 to vector<16x256xf32>
    %260 = arith.addf %258, %259 : vector<16x256xf32>
    %261 = arith.mulf %260, %247 : vector<16x256xf32>
    %cst_66 = arith.constant 5.000000e-01 : f32
    %262 = vector.broadcast %cst_66 : f32 to vector<16x256xf32>
    %263 = arith.mulf %262, %261 : vector<16x256xf32>
    %cst_67 = arith.constant 0.000000e+00 : f32
    %264 = vector.broadcast %cst_67 : f32 to vector<16x256xf32>
    %265 = arith.subf %264, %242 : vector<16x256xf32>
    %266 = arith.mulf %265, %242 : vector<16x256xf32>
    %267 = math.exp %266 : vector<16x256xf32>
    %268 = arith.mulf %263, %267 : vector<16x256xf32>
    %cst_68 = arith.constant 0.000000e+00 : f32
    %269 = vector.broadcast %cst_68 : f32 to vector<16x256xf32>
    %270 = arith.cmpf oge, %239, %269 : vector<16x256xf32>
    %cst_69 = arith.constant 1.000000e+00 : f32
    %271 = vector.broadcast %cst_69 : f32 to vector<16x256xf32>
    %272 = arith.subf %271, %268 : vector<16x256xf32>
    %273 = arith.select %270, %272, %268 : vector<16x256xi1>, vector<16x256xf32>
    %274 = arith.mulf %239, %273 : vector<16x256xf32>
    %275 = arith.truncf %274 : vector<16x256xf32> to vector<16x256xbf16>
    %c0_70 = arith.constant 0 : index
    %c0_71 = arith.constant 0 : index
    %276 = vector.load %arg10[%c0_70, %c0_71] : memref<1024x32xbf16, #tpu.memory_space<vmem>>, vector<256x32xbf16>
    %cst_72 = arith.constant dense<0.000000e+00> : vector<16x32xf32>
    %277 = tpu.matmul %275, %276, %cst_72 {dimension_numbers = #tpu.dot_dimension_numbers<[1], [0], [0], [1], [0, 0, 1, 1], [], []>} : vector<16x256xbf16>, vector<256x32xbf16>, vector<16x32xf32> -> vector<16x32xf32>
    %278 = arith.addf %234, %277 : vector<16x32xf32>
    %c0_73 = arith.constant 0 : index
    %c256 = arith.constant 256 : index
    %279 = vector.load %arg8[%c0_73, %c256] : memref<32x1024xbf16, #tpu.memory_space<vmem>>, vector<32x256xbf16>
    %cst_74 = arith.constant dense<0.000000e+00> : vector<16x256xf32>
    %280 = tpu.matmul %233, %279, %cst_74 {dimension_numbers = #tpu.dot_dimension_numbers<[1], [0], [0], [1], [0, 0, 1, 1], [], []>} : vector<16x32xbf16>, vector<32x256xbf16>, vector<16x256xf32> -> vector<16x256xf32>
    %c0_75 = arith.constant 0 : index
    %c256_76 = arith.constant 256 : index
    %281 = vector.load %arg9[%c0_75, %c256_76] : memref<1x1024xf32, #tpu.memory_space<vmem>>, vector<1x256xf32>
    %282 = vector.broadcast %281 : vector<1x256xf32> to vector<16x256xf32>
    %283 = arith.addf %280, %282 : vector<16x256xf32>
    %284 = math.absf %283 : vector<16x256xf32>
    %cst_77 = arith.constant 0.707106769 : f32
    %285 = vector.broadcast %cst_77 : f32 to vector<16x256xf32>
    %286 = arith.mulf %284, %285 : vector<16x256xf32>
    %cst_78 = arith.constant 0.327591091 : f32
    %287 = vector.broadcast %cst_78 : f32 to vector<16x256xf32>
    %288 = arith.mulf %287, %286 : vector<16x256xf32>
    %cst_79 = arith.constant 1.000000e+00 : f32
    %289 = vector.broadcast %cst_79 : f32 to vector<16x256xf32>
    %290 = arith.addf %289, %288 : vector<16x256xf32>
    %291 = tpu.reciprocal %290 {approx = true} : vector<16x256xf32> -> vector<16x256xf32>
    %cst_80 = arith.constant 1.06140542 : f32
    %292 = vector.broadcast %cst_80 : f32 to vector<16x256xf32>
    %293 = arith.mulf %292, %291 : vector<16x256xf32>
    %cst_81 = arith.constant -1.45315206 : f32
    %294 = vector.broadcast %cst_81 : f32 to vector<16x256xf32>
    %295 = arith.addf %293, %294 : vector<16x256xf32>
    %296 = arith.mulf %295, %291 : vector<16x256xf32>
    %cst_82 = arith.constant 1.42141378 : f32
    %297 = vector.broadcast %cst_82 : f32 to vector<16x256xf32>
    %298 = arith.addf %296, %297 : vector<16x256xf32>
    %299 = arith.mulf %298, %291 : vector<16x256xf32>
    %cst_83 = arith.constant -0.284496725 : f32
    %300 = vector.broadcast %cst_83 : f32 to vector<16x256xf32>
    %301 = arith.addf %299, %300 : vector<16x256xf32>
    %302 = arith.mulf %301, %291 : vector<16x256xf32>
    %cst_84 = arith.constant 0.254829586 : f32
    %303 = vector.broadcast %cst_84 : f32 to vector<16x256xf32>
    %304 = arith.addf %302, %303 : vector<16x256xf32>
    %305 = arith.mulf %304, %291 : vector<16x256xf32>
    %cst_85 = arith.constant 5.000000e-01 : f32
    %306 = vector.broadcast %cst_85 : f32 to vector<16x256xf32>
    %307 = arith.mulf %306, %305 : vector<16x256xf32>
    %cst_86 = arith.constant 0.000000e+00 : f32
    %308 = vector.broadcast %cst_86 : f32 to vector<16x256xf32>
    %309 = arith.subf %308, %286 : vector<16x256xf32>
    %310 = arith.mulf %309, %286 : vector<16x256xf32>
    %311 = math.exp %310 : vector<16x256xf32>
    %312 = arith.mulf %307, %311 : vector<16x256xf32>
    %cst_87 = arith.constant 0.000000e+00 : f32
    %313 = vector.broadcast %cst_87 : f32 to vector<16x256xf32>
    %314 = arith.cmpf oge, %283, %313 : vector<16x256xf32>
    %cst_88 = arith.constant 1.000000e+00 : f32
    %315 = vector.broadcast %cst_88 : f32 to vector<16x256xf32>
    %316 = arith.subf %315, %312 : vector<16x256xf32>
    %317 = arith.select %314, %316, %312 : vector<16x256xi1>, vector<16x256xf32>
    %318 = arith.mulf %283, %317 : vector<16x256xf32>
    %319 = arith.truncf %318 : vector<16x256xf32> to vector<16x256xbf16>
    %c256_89 = arith.constant 256 : index
    %c0_90 = arith.constant 0 : index
    %320 = vector.load %arg10[%c256_89, %c0_90] : memref<1024x32xbf16, #tpu.memory_space<vmem>>, vector<256x32xbf16>
    %cst_91 = arith.constant dense<0.000000e+00> : vector<16x32xf32>
    %321 = tpu.matmul %319, %320, %cst_91 {dimension_numbers = #tpu.dot_dimension_numbers<[1], [0], [0], [1], [0, 0, 1, 1], [], []>} : vector<16x256xbf16>, vector<256x32xbf16>, vector<16x32xf32> -> vector<16x32xf32>
    %322 = arith.addf %278, %321 : vector<16x32xf32>
    %c0_92 = arith.constant 0 : index
    %c512 = arith.constant 512 : index
    %323 = vector.load %arg8[%c0_92, %c512] : memref<32x1024xbf16, #tpu.memory_space<vmem>>, vector<32x256xbf16>
    %cst_93 = arith.constant dense<0.000000e+00> : vector<16x256xf32>
    %324 = tpu.matmul %233, %323, %cst_93 {dimension_numbers = #tpu.dot_dimension_numbers<[1], [0], [0], [1], [0, 0, 1, 1], [], []>} : vector<16x32xbf16>, vector<32x256xbf16>, vector<16x256xf32> -> vector<16x256xf32>
    %c0_94 = arith.constant 0 : index
    %c512_95 = arith.constant 512 : index
    %325 = vector.load %arg9[%c0_94, %c512_95] : memref<1x1024xf32, #tpu.memory_space<vmem>>, vector<1x256xf32>
    %326 = vector.broadcast %325 : vector<1x256xf32> to vector<16x256xf32>
    %327 = arith.addf %324, %326 : vector<16x256xf32>
    %328 = math.absf %327 : vector<16x256xf32>
    %cst_96 = arith.constant 0.707106769 : f32
    %329 = vector.broadcast %cst_96 : f32 to vector<16x256xf32>
    %330 = arith.mulf %328, %329 : vector<16x256xf32>
    %cst_97 = arith.constant 0.327591091 : f32
    %331 = vector.broadcast %cst_97 : f32 to vector<16x256xf32>
    %332 = arith.mulf %331, %330 : vector<16x256xf32>
    %cst_98 = arith.constant 1.000000e+00 : f32
    %333 = vector.broadcast %cst_98 : f32 to vector<16x256xf32>
    %334 = arith.addf %333, %332 : vector<16x256xf32>
    %335 = tpu.reciprocal %334 {approx = true} : vector<16x256xf32> -> vector<16x256xf32>
    %cst_99 = arith.constant 1.06140542 : f32
    %336 = vector.broadcast %cst_99 : f32 to vector<16x256xf32>
    %337 = arith.mulf %336, %335 : vector<16x256xf32>
    %cst_100 = arith.constant -1.45315206 : f32
    %338 = vector.broadcast %cst_100 : f32 to vector<16x256xf32>
    %339 = arith.addf %337, %338 : vector<16x256xf32>
    %340 = arith.mulf %339, %335 : vector<16x256xf32>
    %cst_101 = arith.constant 1.42141378 : f32
    %341 = vector.broadcast %cst_101 : f32 to vector<16x256xf32>
    %342 = arith.addf %340, %341 : vector<16x256xf32>
    %343 = arith.mulf %342, %335 : vector<16x256xf32>
    %cst_102 = arith.constant -0.284496725 : f32
    %344 = vector.broadcast %cst_102 : f32 to vector<16x256xf32>
    %345 = arith.addf %343, %344 : vector<16x256xf32>
    %346 = arith.mulf %345, %335 : vector<16x256xf32>
    %cst_103 = arith.constant 0.254829586 : f32
    %347 = vector.broadcast %cst_103 : f32 to vector<16x256xf32>
    %348 = arith.addf %346, %347 : vector<16x256xf32>
    %349 = arith.mulf %348, %335 : vector<16x256xf32>
    %cst_104 = arith.constant 5.000000e-01 : f32
    %350 = vector.broadcast %cst_104 : f32 to vector<16x256xf32>
    %351 = arith.mulf %350, %349 : vector<16x256xf32>
    %cst_105 = arith.constant 0.000000e+00 : f32
    %352 = vector.broadcast %cst_105 : f32 to vector<16x256xf32>
    %353 = arith.subf %352, %330 : vector<16x256xf32>
    %354 = arith.mulf %353, %330 : vector<16x256xf32>
    %355 = math.exp %354 : vector<16x256xf32>
    %356 = arith.mulf %351, %355 : vector<16x256xf32>
    %cst_106 = arith.constant 0.000000e+00 : f32
    %357 = vector.broadcast %cst_106 : f32 to vector<16x256xf32>
    %358 = arith.cmpf oge, %327, %357 : vector<16x256xf32>
    %cst_107 = arith.constant 1.000000e+00 : f32
    %359 = vector.broadcast %cst_107 : f32 to vector<16x256xf32>
    %360 = arith.subf %359, %356 : vector<16x256xf32>
    %361 = arith.select %358, %360, %356 : vector<16x256xi1>, vector<16x256xf32>
    %362 = arith.mulf %327, %361 : vector<16x256xf32>
    %363 = arith.truncf %362 : vector<16x256xf32> to vector<16x256xbf16>
    %c512_108 = arith.constant 512 : index
    %c0_109 = arith.constant 0 : index
    %364 = vector.load %arg10[%c512_108, %c0_109] : memref<1024x32xbf16, #tpu.memory_space<vmem>>, vector<256x32xbf16>
    %cst_110 = arith.constant dense<0.000000e+00> : vector<16x32xf32>
    %365 = tpu.matmul %363, %364, %cst_110 {dimension_numbers = #tpu.dot_dimension_numbers<[1], [0], [0], [1], [0, 0, 1, 1], [], []>} : vector<16x256xbf16>, vector<256x32xbf16>, vector<16x32xf32> -> vector<16x32xf32>
    %366 = arith.addf %322, %365 : vector<16x32xf32>
    %c0_111 = arith.constant 0 : index
    %c768 = arith.constant 768 : index
    %367 = vector.load %arg8[%c0_111, %c768] : memref<32x1024xbf16, #tpu.memory_space<vmem>>, vector<32x256xbf16>
    %cst_112 = arith.constant dense<0.000000e+00> : vector<16x256xf32>
    %368 = tpu.matmul %233, %367, %cst_112 {dimension_numbers = #tpu.dot_dimension_numbers<[1], [0], [0], [1], [0, 0, 1, 1], [], []>} : vector<16x32xbf16>, vector<32x256xbf16>, vector<16x256xf32> -> vector<16x256xf32>
    %c0_113 = arith.constant 0 : index
    %c768_114 = arith.constant 768 : index
    %369 = vector.load %arg9[%c0_113, %c768_114] : memref<1x1024xf32, #tpu.memory_space<vmem>>, vector<1x256xf32>
    %370 = vector.broadcast %369 : vector<1x256xf32> to vector<16x256xf32>
    %371 = arith.addf %368, %370 : vector<16x256xf32>
    %372 = math.absf %371 : vector<16x256xf32>
    %cst_115 = arith.constant 0.707106769 : f32
    %373 = vector.broadcast %cst_115 : f32 to vector<16x256xf32>
    %374 = arith.mulf %372, %373 : vector<16x256xf32>
    %cst_116 = arith.constant 0.327591091 : f32
    %375 = vector.broadcast %cst_116 : f32 to vector<16x256xf32>
    %376 = arith.mulf %375, %374 : vector<16x256xf32>
    %cst_117 = arith.constant 1.000000e+00 : f32
    %377 = vector.broadcast %cst_117 : f32 to vector<16x256xf32>
    %378 = arith.addf %377, %376 : vector<16x256xf32>
    %379 = tpu.reciprocal %378 {approx = true} : vector<16x256xf32> -> vector<16x256xf32>
    %cst_118 = arith.constant 1.06140542 : f32
    %380 = vector.broadcast %cst_118 : f32 to vector<16x256xf32>
    %381 = arith.mulf %380, %379 : vector<16x256xf32>
    %cst_119 = arith.constant -1.45315206 : f32
    %382 = vector.broadcast %cst_119 : f32 to vector<16x256xf32>
    %383 = arith.addf %381, %382 : vector<16x256xf32>
    %384 = arith.mulf %383, %379 : vector<16x256xf32>
    %cst_120 = arith.constant 1.42141378 : f32
    %385 = vector.broadcast %cst_120 : f32 to vector<16x256xf32>
    %386 = arith.addf %384, %385 : vector<16x256xf32>
    %387 = arith.mulf %386, %379 : vector<16x256xf32>
    %cst_121 = arith.constant -0.284496725 : f32
    %388 = vector.broadcast %cst_121 : f32 to vector<16x256xf32>
    %389 = arith.addf %387, %388 : vector<16x256xf32>
    %390 = arith.mulf %389, %379 : vector<16x256xf32>
    %cst_122 = arith.constant 0.254829586 : f32
    %391 = vector.broadcast %cst_122 : f32 to vector<16x256xf32>
    %392 = arith.addf %390, %391 : vector<16x256xf32>
    %393 = arith.mulf %392, %379 : vector<16x256xf32>
    %cst_123 = arith.constant 5.000000e-01 : f32
    %394 = vector.broadcast %cst_123 : f32 to vector<16x256xf32>
    %395 = arith.mulf %394, %393 : vector<16x256xf32>
    %cst_124 = arith.constant 0.000000e+00 : f32
    %396 = vector.broadcast %cst_124 : f32 to vector<16x256xf32>
    %397 = arith.subf %396, %374 : vector<16x256xf32>
    %398 = arith.mulf %397, %374 : vector<16x256xf32>
    %399 = math.exp %398 : vector<16x256xf32>
    %400 = arith.mulf %395, %399 : vector<16x256xf32>
    %cst_125 = arith.constant 0.000000e+00 : f32
    %401 = vector.broadcast %cst_125 : f32 to vector<16x256xf32>
    %402 = arith.cmpf oge, %371, %401 : vector<16x256xf32>
    %cst_126 = arith.constant 1.000000e+00 : f32
    %403 = vector.broadcast %cst_126 : f32 to vector<16x256xf32>
    %404 = arith.subf %403, %400 : vector<16x256xf32>
    %405 = arith.select %402, %404, %400 : vector<16x256xi1>, vector<16x256xf32>
    %406 = arith.mulf %371, %405 : vector<16x256xf32>
    %407 = arith.truncf %406 : vector<16x256xf32> to vector<16x256xbf16>
    %c768_127 = arith.constant 768 : index
    %c0_128 = arith.constant 0 : index
    %408 = vector.load %arg10[%c768_127, %c0_128] : memref<1024x32xbf16, #tpu.memory_space<vmem>>, vector<256x32xbf16>
    %cst_129 = arith.constant dense<0.000000e+00> : vector<16x32xf32>
    %409 = tpu.matmul %407, %408, %cst_129 {dimension_numbers = #tpu.dot_dimension_numbers<[1], [0], [0], [1], [0, 0, 1, 1], [], []>} : vector<16x256xbf16>, vector<256x32xbf16>, vector<16x32xf32> -> vector<16x32xf32>
    %410 = arith.addf %366, %409 : vector<16x32xf32>
    %411 = arith.addf %216, %410 : vector<16x32xf32>
    %c0_130 = arith.constant 0 : index
    %c0_131 = arith.constant 0 : index
    %412 = vector.load %arg11[%c0_130, %c0_131] : memref<1x32xf32, #tpu.memory_space<vmem>>, vector<1x32xf32>
    %413 = vector.broadcast %412 : vector<1x32xf32> to vector<16x32xf32>
    %414 = arith.addf %411, %413 : vector<16x32xf32>
    %c0_132 = arith.constant 0 : index
    %c0_133 = arith.constant 0 : index
    %415 = vector.load %arg12[%c0_132, %c0_133] : memref<16x32xf32, #tpu.memory_space<vmem>>, vector<16x32xf32>
    tpu.vector_store %arg12[%c0_132, %c0_133], %414 {strides = array<i32>} : memref<16x32xf32, #tpu.memory_space<vmem>>, vector<16x32xf32>,
    return
  }
  func.func @transform_0(%arg0: i32) -> (i32, i32) {
    %c0_i32 = arith.constant 0 : i32
    %c0_i32_0 = arith.constant 0 : i32
    return %arg0, %c0_i32 : i32, i32
  }
  func.func @transform_1(%arg0: i32) -> (i32, i32) {
    %c0_i32 = arith.constant 0 : i32
    %c0_i32_0 = arith.constant 0 : i32
    %c0_i32_1 = arith.constant 0 : i32
    return %c0_i32, %c0_i32_0 : i32, i32
  }
  func.func @transform_2(%arg0: i32) -> (i32, i32) {
    %c0_i32 = arith.constant 0 : i32
    %c0_i32_0 = arith.constant 0 : i32
    %c0_i32_1 = arith.constant 0 : i32
    return %c0_i32, %c0_i32_0 : i32, i32
  }
  func.func @transform_3(%arg0: i32) -> (i32, i32) {
    %c0_i32 = arith.constant 0 : i32
    %c0_i32_0 = arith.constant 0 : i32
    %c0_i32_1 = arith.constant 0 : i32
    return %c0_i32, %c0_i32_0 : i32, i32
  }
  func.func @transform_4(%arg0: i32) -> (i32, i32) {
    %c0_i32 = arith.constant 0 : i32
    %c0_i32_0 = arith.constant 0 : i32
    %c0_i32_1 = arith.constant 0 : i32
    return %c0_i32, %c0_i32_0 : i32, i32
  }
  func.func @transform_5(%arg0: i32) -> (i32, i32) {
    %c0_i32 = arith.constant 0 : i32
    %c0_i32_0 = arith.constant 0 : i32
    %c0_i32_1 = arith.constant 0 : i32
    return %c0_i32, %c0_i32_0 : i32, i32
  }
  func.func @transform_6(%arg0: i32) -> (i32, i32) {
    %c0_i32 = arith.constant 0 : i32
    %c0_i32_0 = arith.constant 0 : i32
    %c0_i32_1 = arith.constant 0 : i32
    return %c0_i32, %c0_i32_0 : i32, i32
  }
  func.func @transform_7(%arg0: i32) -> (i32, i32) {
    %c0_i32 = arith.constant 0 : i32
    %c0_i32_0 = arith.constant 0 : i32
    %c0_i32_1 = arith.constant 0 : i32
    return %c0_i32, %c0_i32_0 : i32, i32
  }
  func.func @transform_8(%arg0: i32) -> (i32, i32) {
    %c0_i32 = arith.constant 0 : i32
    %c0_i32_0 = arith.constant 0 : i32
    %c0_i32_1 = arith.constant 0 : i32
    return %c0_i32, %c0_i32_0 : i32, i32
  }
  func.func @transform_9(%arg0: i32) -> (i32, i32) {
    %c0_i32 = arith.constant 0 : i32
    %c0_i32_0 = arith.constant 0 : i32
    %c0_i32_1 = arith.constant 0 : i32
    return %c0_i32, %c0_i32_0 : i32, i32
  }
  func.func @transform_10(%arg0: i32) -> (i32, i32) {
    %c0_i32 = arith.constant 0 : i32
    %c0_i32_0 = arith.constant 0 : i32
    %c0_i32_1 = arith.constant 0 : i32
    return %c0_i32, %c0_i32_0 : i32, i32
  }
  func.func @transform_11(%arg0: i32) -> (i32, i32) {
    %c0_i32 = arith.constant 0 : i32
    %c0_i32_0 = arith.constant 0 : i32
    return %arg0, %c0_i32 : i32, i32
  }
}

</mosaic_0001>

<bundles_post_ra>
// kernel: transformer_block.1
= control target key start
LH: loop header
LB: loop body
LE: loop exit
PB: predicated region body
PF: predicated region fallthrough
CT: control target
= control target key end

     0   :  { %vm42_vm0 = vcmask 261120   ;;  %s5060_s0 = inlined_call_operand.vmem [shape: f32[16,32], index: 0, kind: input, shape index: {}]   ;;  %s5061_s1 = inlined_call_operand.vmem [shape: f32[32,96], index: 1, kind: input, shape index: {}]   ;;  %s5062_s2 = inlined_call_operand.vmem [shape: f32[1,96], index: 2, kind: input, shape index: {}]   ;;  %s5063_s3 = inlined_call_operand.vmem [shape: f32[32,32], index: 3, kind: input, shape index: {}]   ;;  %s5064_s4 = inlined_call_operand.vmem [shape: f32[1,32], index: 4, kind: input, shape index: {}]   ;;  %s5065_s5 = inlined_call_operand.vmem [shape: f32[32,4], index: 5, kind: input, shape index: {}]   ;;  %s5066_s6 = inlined_call_operand.vmem [shape: f32[4,32], index: 6, kind: input, shape index: {}]   ;;  %s5067_s7 = inlined_call_operand.vmem [shape: bf16[32,1024], index: 7, kind: input, shape index: {}]   ;;  %s5068_s8 = inlined_call_operand.vmem [shape: f32[1,1024], index: 8, kind: input, shape index: {}]   ;;  %s5069_s9 = inlined_call_operand.vmem [shape: bf16[1024,32], index: 9, kind: input, shape index: {}]   ;;  %s5070_s10 = inlined_call_operand.vmem [shape: f32[1,32], index: 10, kind: input, shape index: {}]   ;;  %s5071_s11 = inlined_call_operand.hbm [shape: f32[16,32], index: 11, kind: output, shape index: {}]  }
   0x1   :  { %v40_v0 = vld [vmem:[%s5060_s0] sm:$0xff]  ;;  %v41_v1 = vld [vmem:[%s5060_s0 + $0x8] sm:$0xff] }
   0x2   :  { %v43_v2 = vsel %vm42_vm0, %v40_v0, 0.0  ;;  %v46_v3 = vsel %vm42_vm0, %v41_v1, 0.0 }
   0x3   :  { %44 = vadd.xlane.f32.xlu0 %v43_v2 }
   0x7   :  { %47 = vadd.xlane.f32.xlu0 %v46_v3 }
   0x8   :  { %16 = vsyncpa [#allocation3], 0  ;;  %v73_v14 = vld [vmem:[%s5061_s1 + $0x18] sm:$0xff]  ;;  %v72_v15 = vld [vmem:[%s5061_s1 + $0x10] sm:$0xff]  ;;  %v167_v30 = vlaneseq  ;;  %vm1147_vm1 = vcmask 1043456   ;;  %vm1028_vm4 = vcmask 31744  }
   0x9   :  { %3733 = vmatprep.subr.mxu0 %v73_v14  ;;  %v71_v16 = vld [vmem:[%s5061_s1 + $0x8] sm:$0xff]  ;;  %v70_v17 = vld [vmem:[%s5061_s1] sm:$0xff]  ;;  %v4178_v28 = vld [vmem:[%s5065_s5 + $0x18] sm:$0xff] }
   0xa   :  { %3734 = vmatpush3.msra.mxu0 %v73_v14  ;;  %v4183_v29 = vld [vmem:[%s5065_s5 + $0x10] sm:$0xff]  ;;  %3744 = vmatprep.subr.mxu1 %v4178_v28  ;;  %v4196_v31 = vld [vmem:[%s5065_s5 + $0x8] sm:$0xff]  ;;  %v4204_v32 = vld [vmem:[%s5065_s5] sm:$0xff]  ;;  %v4207_v33 = vshrl.u32 %v167_v30, 7  ;;  %s4085_s5 = smov 96  }
   0xb   :  { %3735 = vmatprep.subr.mxu0 %v72_v15  ;;  %3745 = vmatpush3.msra.mxu1 %v4178_v28  ;;  %v3430_v34 = vld [vmem:[%s5062_s2] ss:$0 sm:$0xff]  ;;  %s4086_s2 = smov 64  }
   0xc   :  { %3736 = vmatpush3.msra.mxu0 %v72_v15  ;;  %3746 = vmatprep.subr.mxu1 %v4183_v29  ;;  %v4219_v35 = vsub.s32 0, %v4207_v33  ;;  %v4228_v41 = vsub.s32 1, %v4207_v33  ;;  %v388_v43 = vsub.s32 2, %v4207_v33  ;;  %v495_v47 = vsub.s32 3, %v4207_v33 }
   0xd   :  { %3737 = vmatprep.subr.mxu0 %v71_v16  ;;  %3747 = vmatpush3.msra.mxu1 %v4183_v29  ;;  %v602_v49 = vsub.s32 4, %v4207_v33  ;;  %v709_v53 = vsub.s32 5, %v4207_v33  ;;  %v816_v56 = vsub.s32 6, %v4207_v33  ;;  %v923_v60 = vsub.s32 7, %v4207_v33 }
   0xe   :  { %3738 = vmatpush3.msra.mxu0 %v71_v16  ;;  %3748 = vmatprep.subr.mxu1 %v4196_v31 }
   0xf   :  { %3739 = vmatprep.subr.mxu0 %v70_v17  ;;  %3749 = vmatpush3.msra.mxu1 %v4196_v31 }
  0x10   :  { %3740 = vmatpush3.msra.mxu0 %v70_v17  ;;  %3750 = vmatprep.subr.mxu1 %v4204_v32 }
  0x11   :  { %3755 = vmatprep.subr.mxu0 %v4178_v28  ;;  %3751 = vmatpush3.msra.mxu1 %v4204_v32 }
  0x12   :  { %3766 = vmatprep.subr.mxu1 %v4178_v28 }
  0x8c   :  { %v45_v4 = vpop.xlane.xlu0 %44 }
  0x8d   :  { %v50_v5 = vmul.f32 0.03125, %v45_v4 }
  0x8f   :  { %v52_v6 = vsub.f32 %v40_v0, %v50_v5 }
  0x90   :  { %v48_v7 = vpop.xlane.xlu0 %47 }
  0x91   :  { %v51_v8 = vmul.f32 0.03125, %v48_v7  ;;  %v54_v9 = vmul.f32 %v52_v6, %v52_v6 }
  0x93   :  { %v53_v10 = vsub.f32 %v41_v1, %v51_v8  ;;  %v56_v11 = vsel %vm42_vm0, %v54_v9, 0.0 }
  0x94   :  { %57 = vadd.xlane.f32.xlu1 %v56_v11 }
  0x95   :  { %v55_v12 = vmul.f32 %v53_v10, %v53_v10 }
  0x97   :  { %v59_v13 = vsel %vm42_vm0, %v55_v12, 0.0 }
  0x98   :  { %60 = vadd.xlane.f32.xlu1 %v59_v13 }
 0x11d   :  { %v58_v18 = vpop.xlane.xlu1 %57 }
 0x11e   :  { %v62_v19 = vmul.f32 0.03125, %v58_v18 }
 0x120   :  { %v64_v20 = vadd.f32 1e-05, %v62_v19 }
 0x121   :  { %v61_v21 = vpop.xlane.xlu1 %60 }
 0x122   :  { %3953 = vrsqrt.f32 %v64_v20  ;;  %v63_v22 = vmul.f32 0.03125, %v61_v21 }
 0x124   :  { %v65_v23 = vadd.f32 1e-05, %v63_v22 }
 0x126   :  { %3955 = vrsqrt.f32 %v65_v23 }
 0x12f   :  { %v3954_v24 = vpop.eup %3953 }
 0x130   :  { %v68_v25 = vmul.f32 %v3954_v24, %v52_v6 }
 0x132   :  { %3741 = vmatprep.mubr.msk.f32.mxu0 %vm42_vm0, %v68_v25 }
 0x133   :  { %v3956_v26 = vpop.eup %3955 }
 0x134   :  { %v69_v27 = vmul.f32 %v3956_v26, %v53_v10 }
 0x136   :  { %3742 = vmatmul.mubr.msk.f32.vlgmr.msra.gmra.mxu0 %vm42_vm0, %v69_v27 }
 0x137   :  { %3756 = vmatpush3.msra.mxu0 %v4178_v28 }
 0x138   :  { %3757 = vmatprep.subr.mxu0 %v4183_v29 }
 0x139   :  { %3758 = vmatpush3.msra.mxu0 %v4183_v29 }
 0x13a   :  { %3759 = vmatprep.subr.mxu0 %v4196_v31 }
 0x13b   :  { %3760 = vmatpush3.msra.mxu0 %v4196_v31 }
 0x13c   :  { %3761 = vmatprep.subr.mxu0 %v4204_v32 }
 0x13d   :  { %3762 = vmatpush3.msra.mxu0 %v4204_v32 }
 0x13e   :  { %3777 = vmatprep.subr.mxu0 %v4178_v28 }
 0x1f6   :  { %v3743_v36 = vpop.f32.mrf.mxu0 }
 0x1f7   :  { %v4221_v37 = vadd.f32 %v3743_v36, %v3430_v34 }
 0x1f8   :  { %v153_v38 = vpop.f32.mrf.mxu0 }
 0x1f9   :  { %v4223_v39 = vadd.f32 %v3430_v34, %v153_v38  ;;  %v179_v40 = vrot.slane %v4221_v37, %v4219_v35  ;;  %v286_v44 = vrot.slane %v4221_v37, %v4228_v41  ;;  %v393_v45 = vrot.slane %v4221_v37, %v388_v43 }
 0x1fa   :  { %v500_v50 = vrot.slane %v4221_v37, %v495_v47  ;;  %v607_v51 = vrot.slane %v4221_v37, %v602_v49  ;;  %v714_v55 = vrot.slane %v4221_v37, %v709_v53  ;;  %v821_v59 = vrot.slane %v4221_v37, %v816_v56 }
 0x1fb   :  { %184 = vrot.lane.b32.xlu1 %v179_v40, %s4085_s5  ;;  %v175_v42 = vrot.slane %v4223_v39, %v4219_v35  ;;  %v282_v46 = vrot.slane %v4223_v39, %v4228_v41  ;;  %v389_v48 = vrot.slane %v4223_v39, %v388_v43  ;;  %v496_v52 = vrot.slane %v4223_v39, %v495_v47 }
 0x1fc   :  { %v603_v54 = vrot.slane %v4223_v39, %v602_v49  ;;  %v817_v57 = vrot.slane %v4223_v39, %v816_v56  ;;  %v710_v58 = vrot.slane %v4223_v39, %v709_v53  ;;  %v924_v61 = vrot.slane %v4223_v39, %v923_v60 }
 0x1fd   :  { %182 = vrot.lane.b32.xlu0 %v175_v42, %s4085_s5  ;;  %v928_v62 = vrot.slane %v4221_v37, %v923_v60  ;;  %v169_v38 = vadd.s32 8, %v4207_v33 }
 0x1ff   :  { %291 = vrot.lane.b32.xlu1 %v286_v44, %s4085_s5  ;;  %v171_v43 = vand.u32 7, %v169_v38 }
 0x201   :  { %398 = vrot.lane.b32.xlu0 %v393_v45, %s4085_s5  ;;  %vm486_vm2 = vcmp.ge.s32.totalorder %v171_v43, 2  ;;  %vm593_vm3 = vcmp.ge.s32.totalorder %v171_v43, 3  ;;  %vm379_vm5 = vcmp.ge.s32.totalorder %v171_v43, 1  ;;  %vm700_vm7 = vcmp.ge.s32.totalorder %v171_v43, 4 }
 0x202   :  { %vm807_vm10 = vcmp.ge.s32.totalorder %v171_v43, 5  ;;  %vm914_vm12 = vcmp.ge.s32.totalorder %v171_v43, 6  ;;  %vm1021_vm15 = vcmp.ge.s32.totalorder %v171_v43, 7 }
 0x203   :  { %289 = vrot.lane.b32.xlu1 %v282_v46, %s4085_s5 }
 0x205   :  { %396 = vrot.lane.b32.xlu0 %v389_v48, %s4085_s5 }
 0x207   :  { %505 = vrot.lane.b32.xlu1 %v500_v50, %s4085_s5 }
 0x209   :  { %612 = vrot.lane.b32.xlu0 %v607_v51, %s4085_s5 }
 0x20b   :  { %503 = vrot.lane.b32.xlu1 %v496_v52, %s4085_s5 }
 0x20d   :  { %610 = vrot.lane.b32.xlu0 %v603_v54, %s4085_s5 }
 0x20f   :  { %719 = vrot.lane.b32.xlu1 %v714_v55, %s4085_s5 }
 0x211   :  { %824 = vrot.lane.b32.xlu0 %v817_v57, %s4085_s5 }
 0x213   :  { %717 = vrot.lane.b32.xlu1 %v710_v58, %s4085_s5 }
 0x215   :  { %826 = vrot.lane.b32.xlu0 %v821_v59, %s4085_s5 }
 0x217   :  { %931 = vrot.lane.b32.xlu1 %v924_v61, %s4085_s5 }
 0x219   :  { %1228 = vrot.lane.b32.xlu0 %v179_v40, %s4086_s2 }
 0x21b   :  { %933 = vrot.lane.b32.xlu1 %v928_v62, %s4085_s5 }
 0x21d   :  { %1226 = vrot.lane.b32.xlu0 %v175_v42, %s4086_s2 }
 0x21f   :  { %1321 = vrot.lane.b32.xlu1 %v286_v44, %s4086_s2  ;;  %v4371_v44 = vand.u32 7, %v4207_v33 }
 0x221   :  { %1412 = vrot.lane.b32.xlu0 %v389_v48, %s4086_s2  ;;  %vm378_vm6 = vcmp.ge.s32.totalorder %v4371_v44, 1  ;;  %vm485_vm8 = vcmp.ge.s32.totalorder %v4371_v44, 2  ;;  %vm592_vm9 = vcmp.ge.s32.totalorder %v4371_v44, 3  ;;  %vm699_vm11 = vcmp.ge.s32.totalorder %v4371_v44, 4 }
 0x222   :  { %vm806_vm13 = vcmp.ge.s32.totalorder %v4371_v44, 5  ;;  %vm913_vm14 = vcmp.ge.s32.totalorder %v4371_v44, 6 }
 0x223   :  { %1414 = vrot.lane.b32.xlu1 %v393_v45, %s4086_s2 }
 0x225   :  { %1505 = vrot.lane.b32.xlu0 %v496_v52, %s4086_s2 }
 0x227   :  { %1507 = vrot.lane.b32.xlu1 %v500_v50, %s4086_s2 }
 0x229   :  { %1598 = vrot.lane.b32.xlu0 %v603_v54, %s4086_s2 }
 0x22b   :  { %1319 = vrot.lane.b32.xlu1 %v282_v46, %s4086_s2 }
 0x22d   :  { %1691 = vrot.lane.b32.xlu0 %v710_v58, %s4086_s2 }
 0x22f   :  { %1600 = vrot.lane.b32.xlu1 %v607_v51, %s4086_s2 }
 0x231   :  { %1784 = vrot.lane.b32.xlu0 %v817_v57, %s4086_s2 }
 0x233   :  { %1693 = vrot.lane.b32.xlu1 %v714_v55, %s4086_s2 }
 0x235   :  { %1877 = vrot.lane.b32.xlu0 %v924_v61, %s4086_s2 }
 0x237   :  { %1786 = vrot.lane.b32.xlu1 %v821_v59, %s4086_s2 }
 0x23b   :  { %1879 = vrot.lane.b32.xlu1 %v928_v62, %s4086_s2  ;;  %s4088_s2 = smov [#allocation2]  }
 0x23c   :  { %s3419_s19 = sshll.u32 %s4088_s2, 4  ;;  %s3420_s19 = int_to_ptr.vmem [resolvable:$true] %s3419_s19 }
 0x23d   :  { %s4063_s20 = scalar_lea.vmem %s3420_s19, 256  ;;  %p4068_p1 = scmp.lt.s32.totalorder %s3420_s19, %s3420_s19 }
 0x23e   :  { %p4064_p0 = scmp.ne.s32.totalorder %s3420_s19, %s4063_s20  ;;  %p4069_p2 = scmp.lt.s32.totalorder %s4063_s20, %s4063_s20 }
 0x240   :  { %p4070_p3 = por %p4069_p2, %p4068_p1 }
 0x242   :  { %p4071_p4 = pnand %p4070_p3, %p4064_p0 }
 0x26d   :  { %v185_v63 = vpop.permute.xlu1 %184 }
 0x26e   :  { %v189_v2 = vmul.f32 %v185_v63, %v4221_v37 }
 0x26f   :  { %v183_v0 = vpop.permute.xlu0 %182 }
 0x270   :  { %v188_v1 = vmul.f32 %v183_v0, %v4223_v39 }
 0x271   :  { %v292_v3 = vpop.permute.xlu1 %291 }
 0x272   :  { %3752 = vmatprep.mubr.msk.f32.mxu1 %vm42_vm0, %v188_v1  ;;  %v296_v7 = vmul.f32 %v292_v3, %v4221_v37 }
 0x273   :  { %3753 = vmatmul.mubr.msk.f32.vlgmr.msra.gmra.mxu1 %vm42_vm0, %v189_v2  ;;  %v399_v4 = vpop.permute.xlu0 %398 }
 0x274   :  { %3767 = vmatpush3.msra.mxu1 %v4178_v28  ;;  %v403_v11 = vmul.f32 %v399_v4, %v4221_v37 }
 0x275   :  { %3768 = vmatprep.subr.mxu1 %v4183_v29  ;;  %v290_v5 = vpop.permute.xlu1 %289 }
 0x276   :  { %v295_v6 = vmul.f32 %v290_v5, %v4223_v39  ;;  %3769 = vmatpush3.msra.mxu1 %v4183_v29 }
 0x277   :  { %3770 = vmatprep.subr.mxu1 %v4196_v31  ;;  %v397_v8 = vpop.permute.xlu0 %396 }
 0x278   :  { %3771 = vmatpush3.msra.mxu1 %v4196_v31  ;;  %v402_v9 = vmul.f32 %v397_v8, %v4223_v39  ;;  %3763 = vmatprep.mubr.msk.f32.mxu0 %vm42_vm0, %v295_v6 }
 0x279   :  { %3772 = vmatprep.subr.mxu1 %v4204_v32  ;;  %3764 = vmatmul.mubr.msk.f32.vlgmr.msra.gmra.mxu0 %vm42_vm0, %v296_v7  ;;  %v506_v10 = vpop.permute.xlu1 %505 }
 0x27a   :  { %3778 = vmatpush3.msra.mxu0 %v4178_v28  ;;  %3773 = vmatpush3.msra.mxu1 %v4204_v32  ;;  %v510_v16 = vmul.f32 %v506_v10, %v4221_v37 }
 0x27b   :  { %3774 = vmatprep.mubr.msk.f32.mxu1 %vm42_vm0, %v402_v9  ;;  %3779 = vmatprep.subr.mxu0 %v4183_v29  ;;  %v613_v12 = vpop.permute.xlu0 %612 }
 0x27c   :  { %3788 = vmatprep.subr.mxu1 %v4178_v28  ;;  %3775 = vmatmul.mubr.msk.f32.vlgmr.msra.gmra.mxu1 %vm42_vm0, %v403_v11  ;;  %v617_v20 = vmul.f32 %v613_v12, %v4221_v37 }
 0x27d   :  { %3780 = vmatpush3.msra.mxu0 %v4183_v29  ;;  %3789 = vmatpush3.msra.mxu1 %v4178_v28  ;;  %v504_v13 = vpop.permute.xlu1 %503 }
 0x27e   :  { %3781 = vmatprep.subr.mxu0 %v4196_v31  ;;  %3790 = vmatprep.subr.mxu1 %v4183_v29  ;;  %v509_v14 = vmul.f32 %v504_v13, %v4223_v39 }
 0x27f   :  { %3782 = vmatpush3.msra.mxu0 %v4196_v31  ;;  %3791 = vmatpush3.msra.mxu1 %v4183_v29  ;;  %v611_v15 = vpop.permute.xlu0 %610 }
 0x280   :  { %3783 = vmatprep.subr.mxu0 %v4204_v32  ;;  %3792 = vmatprep.subr.mxu1 %v4196_v31  ;;  %v616_v17 = vmul.f32 %v611_v15, %v4223_v39 }
 0x281   :  { %3784 = vmatpush3.msra.mxu0 %v4204_v32  ;;  %3793 = vmatpush3.msra.mxu1 %v4196_v31  ;;  %v720_v18 = vpop.permute.xlu1 %719 }
 0x282   :  { %3785 = vmatprep.mubr.msk.f32.mxu0 %vm42_vm0, %v509_v14  ;;  %3794 = vmatprep.subr.mxu1 %v4204_v32  ;;  %v724_v27 = vmul.f32 %v720_v18, %v4221_v37 }
 0x283   :  { %3799 = vmatprep.subr.mxu0 %v4178_v28  ;;  %3786 = vmatmul.mubr.msk.f32.vlgmr.msra.gmra.mxu0 %vm42_vm0, %v510_v16  ;;  %v825_v19 = vpop.permute.xlu0 %824 }
 0x284   :  { %3800 = vmatpush3.msra.mxu0 %v4178_v28  ;;  %3795 = vmatpush3.msra.mxu1 %v4204_v32  ;;  %v830_v22 = vmul.f32 %v825_v19, %v4223_v39 }
 0x285   :  { %3796 = vmatprep.mubr.msk.f32.mxu1 %vm42_vm0, %v616_v17  ;;  %3801 = vmatprep.subr.mxu0 %v4183_v29  ;;  %v718_v21 = vpop.permute.xlu1 %717 }
 0x286   :  { %3810 = vmatprep.subr.mxu1 %v4178_v28  ;;  %3797 = vmatmul.mubr.msk.f32.vlgmr.msra.gmra.mxu1 %vm42_vm0, %v617_v20  ;;  %v723_v23 = vmul.f32 %v718_v21, %v4223_v39 }
 0x287   :  { %3802 = vmatpush3.msra.mxu0 %v4183_v29  ;;  %3811 = vmatpush3.msra.mxu1 %v4178_v28  ;;  %v827_v24 = vpop.permute.xlu0 %826 }
 0x288   :  { %3803 = vmatprep.subr.mxu0 %v4196_v31  ;;  %3812 = vmatprep.subr.mxu1 %v4183_v29  ;;  %v831_v26 = vmul.f32 %v827_v24, %v4221_v37 }
 0x289   :  { %3804 = vmatpush3.msra.mxu0 %v4196_v31  ;;  %3813 = vmatpush3.msra.mxu1 %v4183_v29  ;;  %v932_v25 = vpop.permute.xlu1 %931 }
 0x28a   :  { %3805 = vmatprep.subr.mxu0 %v4204_v32  ;;  %3814 = vmatprep.subr.mxu1 %v4196_v31  ;;  %v937_v30 = vmul.f32 %v932_v25, %v4223_v39 }
 0x28b   :  { %3818 = vmatprep.mubr.msk.f32.mxu1 %vm42_vm0, %v830_v22  ;;  %3806 = vmatpush3.msra.mxu0 %v4204_v32 }
 0x28c   :  { %3815 = vmatpush3.msra.mxu1 %v4196_v31  ;;  %3807 = vmatprep.mubr.msk.f32.mxu0 %vm42_vm0, %v723_v23 }
 0x28d   :  { %3816 = vmatprep.subr.mxu1 %v4204_v32  ;;  %3821 = vmatprep.subr.mxu0 %v4178_v28  ;;  %v934_v34 = vpop.permute.xlu1 %933 }
 0x28e   :  { %3808 = vmatmul.mubr.msk.f32.vlgmr.msra.gmra.mxu0 %vm42_vm0, %v724_v27  ;;  %3817 = vmatpush3.msra.mxu1 %v4204_v32  ;;  %v938_v36 = vmul.f32 %v934_v34, %v4221_v37 }
 0x28f   :  { %3822 = vmatpush3.msra.mxu0 %v4178_v28  ;;  %3819 = vmatmul.mubr.msk.f32.vlgmr.msra.gmra.mxu1 %vm42_vm0, %v831_v26  ;;  %v4351_v28 = vld [vmem:[%s5066_s6] sm:$0xf] }
 0x290   :  { %3823 = vmatprep.subr.mxu0 %v4183_v29  ;;  %3829 = vmatprep.mubr.msk.f32.mxu0 %vm42_vm0, %v937_v30 }
 0x291   :  { %3824 = vmatpush3.msra.mxu0 %v4183_v29  ;;  %3837 = vmatprep.subr.msk.mxu1 %vm1147_vm1, %v4351_v28 }
 0x292   :  { %3825 = vmatprep.subr.mxu0 %v4196_v31  ;;  %3838 = vmatpush3.msk.msra.mxu1 %vm1147_vm1, %v4351_v28 }
 0x293   :  { %3826 = vmatpush3.msra.mxu0 %v4196_v31  ;;  %3847 = vmatprep.subr.msk.mxu1 %vm1147_vm1, %v4351_v28 }
 0x294   :  { %3827 = vmatprep.subr.mxu0 %v4204_v32 }
 0x295   :  { %3828 = vmatpush3.msra.mxu0 %v4204_v32 }
 0x296   :  { %3830 = vmatmul.mubr.msk.f32.vlgmr.msra.gmra.mxu0 %vm42_vm0, %v938_v36  ;;  %3832 = vmatprep.subr.msk.mxu0 %vm1147_vm1, %v4351_v28 }
 0x297   :  { %3833 = vmatpush3.msk.msra.mxu0 %vm1147_vm1, %v4351_v28 }
 0x298   :  { %3842 = vmatprep.subr.msk.mxu0 %vm1147_vm1, %v4351_v28 }
 0x333   :  { %v4365_v29 = vpop.f32.mrf.mxu1 }
 0x334   :  { %v1044_v57 = vsel %vm1028_vm4, %v4365_v29, -inf }
 0x335   :  { %v4367_v31 = vpop.f32.mrf.mxu1 }
 0x336   :  { %v1029_v6 = vsel %vm1028_vm4, %v4367_v31, -inf }
 0x339   :  { %v3765_v32 = vpop.f32.mrf.mxu0 }
 0x33a   :  { %v385_v51 = vsel %vm379_vm5, %v3765_v32, -1e+30 }
 0x33b   :  { %v369_v39 = vpop.f32.mrf.mxu0  ;;  %v1045_v61 = vsel %vm1028_vm4, %v385_v51, -inf }
 0x33c   :  { %v3776_v37 = vpop.f32.mrf.mxu1  ;;  %v384_v62 = vsel %vm378_vm6, %v369_v39, -1e+30 }
 0x33d   :  { %v4374_v48 = vsel %vm486_vm2, %v3776_v37, -1e+30  ;;  %vm1020_vm2 = vcmp.ge.s32.totalorder %v4371_v44, 7  ;;  %v1030_v10 = vsel %vm1028_vm4, %v384_v62, -inf }
 0x33e   :  { %v476_v40 = vpop.f32.mrf.mxu1  ;;  %v1046_v54 = vsel %vm1028_vm4, %v4374_v48, -inf }
 0x33f   :  { %v4392_v58 = vsel %vm485_vm8, %v476_v40, -1e+30  ;;  %v1047_v2 = vmax.f32 %v1044_v57, %v1046_v54 }
 0x340   :  { %v1031_v7 = vsel %vm1028_vm4, %v4392_v58, -inf }
 0x341   :  { %v1032_v19 = vmax.f32 %v1029_v6, %v1031_v7 }
 0x343   :  { %v3787_v42 = vpop.f32.mrf.mxu0 }
 0x344   :  { %v4378_v33 = vsel %vm593_vm3, %v3787_v42, -1e+30 }
 0x345   :  { %v583_v46 = vpop.f32.mrf.mxu0  ;;  %v1048_v59 = vsel %vm1028_vm4, %v4378_v33, -inf }
 0x346   :  { %v3798_v45 = vpop.f32.mrf.mxu1  ;;  %v4385_v55 = vsel %vm592_vm9, %v583_v46, -1e+30  ;;  %v1049_v8 = vmax.f32 %v1045_v61, %v1048_v59 }
 0x347   :  { %v706_v52 = vsel %vm700_vm7, %v3798_v45, -1e+30  ;;  %v1033_v3 = vsel %vm1028_vm4, %v4385_v55, -inf }
 0x348   :  { %v690_v47 = vpop.f32.mrf.mxu1  ;;  %v1050_v63 = vsel %vm1028_vm4, %v706_v52, -inf  ;;  %v1034_v15 = vmax.f32 %v1030_v10, %v1033_v3 }
 0x349   :  { %v4410_v4 = vsel %vm699_vm11, %v690_v47, -1e+30  ;;  %v1051_v11 = vmax.f32 %v1047_v2, %v1050_v63 }
 0x34a   :  { %v1035_v16 = vsel %vm1028_vm4, %v4410_v4, -inf }
 0x34b   :  { %v1036_v27 = vmax.f32 %v1032_v19, %v1035_v16 }
 0x34e   :  { %v3809_v49 = vpop.f32.mrf.mxu0 }
 0x34f   :  { %v3820_v50 = vpop.f32.mrf.mxu1  ;;  %v813_v56 = vsel %vm807_vm10, %v3809_v49, -1e+30 }
 0x350   :  { %v797_v53 = vpop.f32.mrf.mxu0  ;;  %v4396_v60 = vsel %vm914_vm12, %v3820_v50, -1e+30  ;;  %v1052_v5 = vsel %vm1028_vm4, %v813_v56, -inf }
 0x351   :  { %v4404_v0 = vsel %vm806_vm13, %v797_v53, -1e+30  ;;  %v904_v1 = vpop.f32.mrf.mxu1  ;;  %v1054_v9 = vsel %vm1028_vm4, %v4396_v60, -inf  ;;  %v1053_v17 = vmax.f32 %v1049_v8, %v1052_v5 }
 0x352   :  { %v1037_v12 = vsel %vm1028_vm4, %v4404_v0, -inf  ;;  %v4424_v13 = vsel %vm913_vm14, %v904_v1, -1e+30  ;;  %v1055_v20 = vmax.f32 %v1051_v11, %v1054_v9 }
 0x353   :  { %v1038_v23 = vmax.f32 %v1034_v15, %v1037_v12  ;;  %v1039_v24 = vsel %vm1028_vm4, %v4424_v13, -inf }
 0x354   :  { %v1040_v32 = vmax.f32 %v1036_v27, %v1039_v24 }
 0x356   :  { %v3831_v14 = vpop.f32.mrf.mxu0 }
 0x357   :  { %v1027_v18 = vsel %vm1021_vm15, %v3831_v14, -1e+30 }
 0x358   :  { %v1056_v21 = vsel %vm1028_vm4, %v1027_v18, -inf  ;;  %v1011_v22 = vpop.f32.mrf.mxu0 }
 0x359   :  { %v1057_v25 = vmax.f32 %v1053_v17, %v1056_v21  ;;  %v1026_v26 = vsel %vm1020_vm2, %v1011_v22, -1e+30 }
 0x35a   :  { %v1041_v30 = vsel %vm1028_vm4, %v1026_v26, -inf }
 0x35b   :  { %v1058_v34 = vmax.f32 %v1055_v20, %v1057_v25  ;;  %v1042_v36 = vmax.f32 %v1038_v23, %v1041_v30 }
 0x35d   :  { %v1060_v37 = vsub.f32 %v4365_v29, %v1058_v34  ;;  %v1062_v38 = vsub.f32 %v385_v51, %v1058_v34  ;;  %v1064_v39 = vsub.f32 %v4374_v48, %v1058_v34  ;;  %v1066_v40 = vsub.f32 %v4378_v33, %v1058_v34 }
 0x35e   :  { %v1068_v42 = vsub.f32 %v706_v52, %v1058_v34  ;;  %v1043_v47 = vmax.f32 %v1040_v32, %v1042_v36  ;;  %v1070_v44 = vsub.f32 %v813_v56, %v1058_v34  ;;  %v1072_v51 = vsub.f32 %v4396_v60, %v1058_v34 }
 0x35f   :  { %v1077_v43 = vmul.f32 1.442695, %v1060_v37  ;;  %v1081_v45 = vmul.f32 1.442695, %v1062_v38  ;;  %v1085_v46 = vmul.f32 1.442695, %v1064_v39 }
 0x360   :  { %v1089_v49 = vmul.f32 1.442695, %v1066_v40  ;;  %v1059_v50 = vsub.f32 %v4367_v31, %v1043_v47  ;;  %v1093_v53 = vmul.f32 1.442695, %v1068_v42  ;;  %v1061_v54 = vsub.f32 %v384_v62, %v1043_v47 }
 0x361   :  { %3957 = vpow2.f32 %v1077_v43  ;;  %v1063_v29 = vsub.f32 %v4392_v58, %v1043_v47  ;;  %v1097_v48 = vmul.f32 1.442695, %v1070_v44  ;;  %v1065_v33 = vsub.f32 %v4385_v55, %v1043_v47 }
 0x362   :  { %3959 = vpow2.f32 %v1081_v45  ;;  %v1075_v52 = vmul.f32 1.442695, %v1059_v50  ;;  %v1067_v56 = vsub.f32 %v4410_v4, %v1043_v47  ;;  %v1079_v57 = vmul.f32 1.442695, %v1061_v54 }
 0x363   :  { %3961 = vpow2.f32 %v1085_v46  ;;  %v1083_v59 = vmul.f32 1.442695, %v1063_v29  ;;  %v1069_v31 = vsub.f32 %v4404_v0, %v1043_v47  ;;  %v1087_v61 = vmul.f32 1.442695, %v1065_v33 }
 0x364   :  { %3963 = vpow2.f32 %v1089_v49  ;;  %v1074_v62 = vsub.f32 %v1027_v18, %v1058_v34  ;;  %v1101_v63 = vmul.f32 1.442695, %v1072_v51  ;;  %v1071_v58 = vsub.f32 %v4424_v13, %v1043_v47 }
 0x365   :  { %3965 = vpow2.f32 %v1093_v53  ;;  %v1091_v1 = vmul.f32 1.442695, %v1067_v56  ;;  %v1073_v55 = vsub.f32 %v1026_v26, %v1043_v47  ;;  %v1095_v60 = vmul.f32 1.442695, %v1069_v31 }
 0x366   :  { %3967 = vpow2.f32 %v1097_v48  ;;  %v1105_v2 = vmul.f32 1.442695, %v1074_v62  ;;  %v1099_v4 = vmul.f32 1.442695, %v1071_v58 }
 0x367   :  { %3969 = vpow2.f32 %v1075_v52  ;;  %v1103_v8 = vmul.f32 1.442695, %v1073_v55 }
 0x368   :  { %3971 = vpow2.f32 %v1079_v57 }
 0x369   :  { %3973 = vpow2.f32 %v1083_v59 }
 0x36a   :  { %3975 = vpow2.f32 %v1087_v61 }
 0x36b   :  { %3977 = vpow2.f32 %v1101_v63 }
 0x36c   :  { %3979 = vpow2.f32 %v1091_v1 }
 0x36d   :  { %3981 = vpow2.f32 %v1095_v60 }
 0x36e   :  { %v3958_v3 = vpop.eup %3957  ;;  %3983 = vpow2.f32 %v1105_v2 }
 0x36f   :  { %v3960_v5 = vpop.eup %3959  ;;  %v1122_v0 = vsel %vm1028_vm4, %v3958_v3, 0.0  ;;  %3985 = vpow2.f32 %v1099_v4 }
 0x370   :  { %v4446_v6 = vpop.eup %3961  ;;  %v1123_v7 = vsel %vm1028_vm4, %v3960_v5, 0.0  ;;  %3987 = vpow2.f32 %v1103_v8  ;;  %v1889_v8 = vld [vmem:[%s5063_s3 + $0x10] sm:$0xff] }
 0x371   :  { %v4449_v9 = vpop.eup %3963  ;;  %v1124_v10 = vadd.f32 %v1123_v7, %v1122_v0  ;;  %v1125_v11 = vsel %vm1028_vm4, %v4446_v6, 0.0  ;;  %v1890_v7 = vld [vmem:[%s5063_s3 + $0x18] sm:$0xff] }
 0x372   :  { %v4453_v12 = vpop.eup %3965  ;;  %v1127_v14 = vsel %vm1028_vm4, %v4449_v9, 0.0 }
 0x373   :  { %v1126_v13 = vadd.f32 %v1125_v11, %v1124_v10  ;;  %v4457_v15 = vpop.eup %3967  ;;  %v1129_v18 = vsel %vm1028_vm4, %v4453_v12, 0.0  ;;  %v1229_v10 = vpop.permute.xlu0 %1228 }
 0x374   :  { %v3970_v17 = vpop.eup %3969  ;;  %v1131_v25 = vsel %vm1028_vm4, %v4457_v15, 0.0  ;;  %v1322_v11 = vpop.permute.xlu1 %1321 }
 0x375   :  { %v1128_v16 = vadd.f32 %v1127_v14, %v1126_v13  ;;  %v3972_v19 = vpop.eup %3971  ;;  %v1107_v21 = vsel %vm1028_vm4, %v3970_v17, 0.0 }
 0x376   :  { %v3974_v22 = vpop.eup %3973  ;;  %v1108_v23 = vsel %vm1028_vm4, %v3972_v19, 0.0 }
 0x377   :  { %v1130_v20 = vadd.f32 %v1129_v18, %v1128_v16  ;;  %v3976_v24 = vpop.eup %3975  ;;  %v1109_v26 = vadd.f32 %v1108_v23, %v1107_v21  ;;  %v1110_v34 = vsel %vm1028_vm4, %v3974_v22, 0.0 }
 0x378   :  { %v4465_v27 = vpop.eup %3977  ;;  %v1112_v37 = vsel %vm1028_vm4, %v3976_v24, 0.0  ;;  %v1415_v13 = vpop.permute.xlu1 %1414 }
 0x379   :  { %v1132_v30 = vadd.f32 %v1131_v25, %v1130_v20  ;;  %v3980_v36 = vpop.eup %3979  ;;  %v1111_v32 = vadd.f32 %v1110_v34, %v1109_v26  ;;  %v1133_v39 = vsel %vm1028_vm4, %v4465_v27, 0.0 }
 0x37a   :  { %v3982_v38 = vpop.eup %3981  ;;  %v1114_v45 = vsel %vm1028_vm4, %v3980_v36, 0.0 }
 0x37b   :  { %v1113_v40 = vadd.f32 %v1112_v37, %v1111_v32  ;;  %v3984_v42 = vpop.eup %3983  ;;  %v1134_v43 = vadd.f32 %v1133_v39, %v1132_v30  ;;  %v1116_v44 = vsel %vm1028_vm4, %v3982_v38, 0.0 }
 0x37c   :  { %v3986_v46 = vpop.eup %3985  ;;  %v1135_v50 = vsel %vm1028_vm4, %v3984_v42, 0.0 }
 0x37d   :  { %v1115_v47 = vadd.f32 %v1114_v45, %v1113_v40  ;;  %v3988_v49 = vpop.eup %3987  ;;  %v1136_v54 = vadd.f32 %v1135_v50, %v1134_v43  ;;  %v1118_v29 = vsel %vm1028_vm4, %v3986_v46, 0.0 }
 0x37e   :  { %v1120_v33 = vsel %vm1028_vm4, %v3988_v49, 0.0 }
 0x37f   :  { %v1117_v53 = vadd.f32 %v1116_v44, %v1115_v47  ;;  %3989 = vrcp.f32 %v1136_v54 }
 0x381   :  { %v1119_v48 = vadd.f32 %v1118_v29, %v1117_v53 }
 0x383   :  { %v1121_v51 = vadd.f32 %v1120_v33, %v1119_v48 }
 0x385   :  { %3991 = vrcp.f32 %v1121_v51 }
 0x38c   :  { %v3990_v52 = vpop.eup %3989 }
 0x38d   :  { %v1140_v31 = vmul.f32 %v3990_v52, %v3958_v3  ;;  %v1237_v61 = vmul.f32 %v3990_v52, %v3960_v5  ;;  %v1330_v58 = vmul.f32 %v3990_v52, %v4446_v6  ;;  %v1423_v1 = vmul.f32 %v3990_v52, %v4449_v9  ;;  %v1887_v9 = vld [vmem:[%s5063_s3] sm:$0xff] }
 0x38e   :  { %v1516_v2 = vmul.f32 %v3990_v52, %v4453_v12  ;;  %v1609_v3 = vmul.f32 %v3990_v52, %v4457_v15  ;;  %v1702_v0 = vmul.f32 %v3990_v52, %v4465_v27  ;;  %v1795_v6 = vmul.f32 %v3990_v52, %v3984_v42  ;;  %v1227_v12 = vpop.permute.xlu0 %1226  ;;  %v1508_v15 = vpop.permute.xlu1 %1507 }
 0x392   :  { %v3992_v56 = vpop.eup %3991  ;;  %v1413_v14 = vpop.permute.xlu0 %1412 }
 0x393   :  { %v1139_v57 = vmul.f32 %v3992_v56, %v3970_v17  ;;  %v1236_v59 = vmul.f32 %v3992_v56, %v3972_v19  ;;  %v1329_v62 = vmul.f32 %v3992_v56, %v3974_v22  ;;  %v1422_v63 = vmul.f32 %v3992_v56, %v3976_v24  ;;  %v1320_v17 = vpop.permute.xlu1 %1319 }
 0x394   :  { %v1515_v55 = vmul.f32 %v3992_v56, %v3980_v36  ;;  %v1608_v60 = vmul.f32 %v3992_v56, %v3982_v38  ;;  %v1701_v4 = vmul.f32 %v3992_v56, %v3986_v46  ;;  %v1794_v5 = vmul.f32 %v3992_v56, %v3988_v49 }
 0x395   :  { %3834 = vmatprep.mubr.msk.f32.mxu0 %vm1028_vm4, %v1139_v57  ;;  %3839 = vmatprep.mubr.msk.f32.mxu1 %vm1028_vm4, %v1236_v59 }
 0x396   :  { %3835 = vmatmul.mubr.msk.f32.vlgmr.msra.gmra.mxu0 %vm1028_vm4, %v1140_v31  ;;  %3840 = vmatmul.mubr.msk.f32.vlgmr.msra.gmra.mxu1 %vm1028_vm4, %v1237_v61  ;;  %v1506_v16 = vpop.permute.xlu0 %1505 }
 0x397   :  { %3843 = vmatpush3.msk.msra.mxu0 %vm1147_vm1, %v4351_v28  ;;  %3844 = vmatprep.mubr.msk.f32.mxu0 %vm1028_vm4, %v1329_v62  ;;  %v1601_v19 = vpop.permute.xlu1 %1600 }
 0x398   :  { %3849 = vmatprep.mubr.msk.f32.mxu1 %vm1028_vm4, %v1422_v63  ;;  %3848 = vmatpush3.msk.msra.mxu1 %vm1147_vm1, %v4351_v28 }
 0x399   :  { %3852 = vmatprep.subr.msk.mxu0 %vm1147_vm1, %v4351_v28  ;;  %3857 = vmatprep.subr.msk.mxu1 %vm1147_vm1, %v4351_v28 }
 0x39a   :  { %3845 = vmatmul.mubr.msk.f32.vlgmr.msra.gmra.mxu0 %vm1028_vm4, %v1330_v58  ;;  %3850 = vmatmul.mubr.msk.f32.vlgmr.msra.gmra.mxu1 %vm1028_vm4, %v1423_v1  ;;  %v1599_v18 = vpop.permute.xlu0 %1598 }
 0x39b   :  { %3853 = vmatpush3.msk.msra.mxu0 %vm1147_vm1, %v4351_v28  ;;  %3854 = vmatprep.mubr.msk.f32.mxu0 %vm1028_vm4, %v1515_v55  ;;  %v1694_v32 = vpop.permute.xlu1 %1693 }
 0x39c   :  { %3859 = vmatprep.mubr.msk.f32.mxu1 %vm1028_vm4, %v1608_v60  ;;  %3858 = vmatpush3.msk.msra.mxu1 %vm1147_vm1, %v4351_v28 }
 0x39d   :  { %3862 = vmatprep.subr.msk.mxu0 %vm1147_vm1, %v4351_v28  ;;  %3867 = vmatprep.subr.msk.mxu1 %vm1147_vm1, %v4351_v28 }
 0x39e   :  { %3855 = vmatmul.mubr.msk.f32.vlgmr.msra.gmra.mxu0 %vm1028_vm4, %v1516_v2  ;;  %3860 = vmatmul.mubr.msk.f32.vlgmr.msra.gmra.mxu1 %vm1028_vm4, %v1609_v3  ;;  %v1692_v26 = vpop.permute.xlu0 %1691 }
 0x39f   :  { %3863 = vmatpush3.msk.msra.mxu0 %vm1147_vm1, %v4351_v28  ;;  %3864 = vmatprep.mubr.msk.f32.mxu0 %vm1028_vm4, %v1701_v4  ;;  %v1787_v51 = vpop.permute.xlu1 %1786 }
 0x3a0   :  { %3869 = vmatprep.mubr.msk.f32.mxu1 %vm1028_vm4, %v1794_v5  ;;  %3868 = vmatpush3.msk.msra.mxu1 %vm1147_vm1, %v4351_v28  ;;  %v1888_v28 = vld [vmem:[%s5063_s3 + $0x8] sm:$0xff] }
 0x3a1   :  { %3872 = vmatprep.subr.mxu0 %v1890_v7 }
 0x3a2   :  { %3865 = vmatmul.mubr.msk.f32.vlgmr.msra.gmra.mxu0 %vm1028_vm4, %v1702_v0  ;;  %3870 = vmatmul.mubr.msk.f32.vlgmr.msra.gmra.mxu1 %vm1028_vm4, %v1795_v6  ;;  %v1785_v49 = vpop.permute.xlu0 %1784 }
 0x3a3   :  { %3873 = vmatpush3.msra.mxu0 %v1890_v7  ;;  %v1880_v0 = vpop.permute.xlu1 %1879 }
 0x3a4   :  { %3874 = vmatprep.subr.mxu0 %v1889_v8 }
 0x3a5   :  { %3875 = vmatpush3.msra.mxu0 %v1889_v8 }
 0x3a6   :  { %3876 = vmatprep.subr.mxu0 %v1888_v28  ;;  %v1878_v4 = vpop.permute.xlu0 %1877 }
 0x3a7   :  { %3877 = vmatpush3.msra.mxu0 %v1888_v28 }
 0x3a8   :  { %3878 = vmatprep.subr.mxu0 %v1887_v9 }
 0x3a9   :  { %3879 = vmatpush3.msra.mxu0 %v1887_v9 }
 0x456   :  { %v3836_v20 = vpop.f32.mrf.mxu0  ;;  %v3841_v21 = vpop.f32.mrf.mxu1 }
 0x457   :  { %v1233_v22 = vmul.f32 %v3836_v20, %v1229_v10  ;;  %v1326_v23 = vmul.f32 %v3841_v21, %v1322_v11  ;;  %v3475_v11 = vld [vmem:[%s5064_s4] ss:$0 sm:$0xff] }
 0x458   :  { %v1217_v24 = vpop.f32.mrf.mxu0  ;;  %v1310_v25 = vpop.f32.mrf.mxu1 }
 0x459   :  { %v1232_v27 = vmul.f32 %v1227_v12, %v1217_v24  ;;  %v1325_v30 = vmul.f32 %v1320_v17, %v1310_v25  ;;  %v1328_v37 = vadd.f32 %v1326_v23, %v1233_v22  ;;  %v4061_v12 = vld [vmem:[%s5060_s0 + $0x8] sm:$0xff] }
 0x45a   :  { %v3846_v34 = vpop.f32.mrf.mxu0  ;;  %v3851_v36 = vpop.f32.mrf.mxu1 }
 0x45b   :  { %v1419_v38 = vmul.f32 %v3846_v34, %v1415_v13  ;;  %v1327_v42 = vadd.f32 %v1325_v30, %v1232_v27  ;;  %v1512_v45 = vmul.f32 %v3851_v36, %v1508_v15 }
 0x45c   :  { %v1403_v39 = vpop.f32.mrf.mxu0  ;;  %v1496_v40 = vpop.f32.mrf.mxu1 }
 0x45d   :  { %v1421_v43 = vadd.f32 %v1419_v38, %v1328_v37  ;;  %v1418_v46 = vmul.f32 %v1413_v14, %v1403_v39  ;;  %v1511_v54 = vmul.f32 %v1506_v16, %v1496_v40  ;;  %v4062_v16 = vld [vmem:[%s5060_s0] sm:$0xff]  ;;  %v2224_v38 = vld [vmem:[%s5067_s7 + $0x48] sm:$0xff] }
 0x45e   :  { %v3856_v47 = vpop.f32.mrf.mxu0  ;;  %v3861_v44 = vpop.f32.mrf.mxu1  ;;  %v2013_v37 = vld [vmem:[%s5067_s7 + $0x60] sm:$0xff] }
 0x45f   :  { %v1514_v50 = vadd.f32 %v1512_v45, %v1421_v43  ;;  %v1420_v53 = vadd.f32 %v1418_v46, %v1327_v42  ;;  %v1605_v29 = vmul.f32 %v3856_v47, %v1601_v19  ;;  %v1698_v57 = vmul.f32 %v3861_v44, %v1694_v32  ;;  %v2012_v32 = vld [vmem:[%s5067_s7 + $0x40] sm:$0xff]  ;;  %v2225_v42 = vld [vmem:[%s5067_s7 + $0x68] sm:$0xff] }
 0x460   :  { %v1589_v48 = vpop.f32.mrf.mxu0  ;;  %v1682_v33 = vpop.f32.mrf.mxu1  ;;  %v3478_v39 = vcombine.low %v2012_v32, %v2013_v37  ;;  %v3479_v40 = vcombine.high %v2012_v32, %v2013_v37  ;;  %v2010_v43 = vld [vmem:[%s5067_s7] sm:$0xff]  ;;  %v4087_v46 = vmov 0   ;;  %v3483_v47 = vcombine.low %v2224_v38, %v2225_v42  ;;  %v4683_v32 = vld [vmem:[%s5067_s7 + $0x50] sm:$0xff] }
 0x461   :  { %v1513_v52 = vadd.f32 %v1511_v54, %v1420_v53  ;;  %v1607_v56 = vadd.f32 %v1605_v29, %v1514_v50  ;;  %v1604_v59 = vmul.f32 %v1599_v18, %v1589_v48  ;;  %v1697_v58 = vmul.f32 %v1692_v26, %v1682_v33  ;;  %v2011_v45 = vld [vmem:[%s5067_s7 + $0x20] sm:$0xff]  ;;  %2081 = vmatprep.mubr.bf16.mxu1 %v4087_v46  ;;  %v2222_v50 = vld [vmem:[%s5067_s7 + $0x8] sm:$0xff]  ;;  %v4688_v37 = vld [vmem:[%s5067_s7 + $0x70] sm:$0xff] }
 0x462   :  { %v3866_v31 = vpop.f32.mrf.mxu0  ;;  %v3871_v61 = vpop.f32.mrf.mxu1  ;;  %v3484_v44 = vcombine.high %v2224_v38, %v2225_v42  ;;  %v2223_v53 = vld [vmem:[%s5067_s7 + $0x28] sm:$0xff]  ;;  %2061 = vmatprep.subr.bf16.mxu1 %v3479_v40  ;;  %v3476_v29 = vcombine.low %v2010_v43, %v2011_v45  ;;  %v3521_v38 = vcombine.high %v4683_v32, %v4688_v37  ;;  %v2014_v40 = vld [vmem:[%s5068_s8] sm:$0x3]  ;;  %v2226_v42 = vld [vmem:[%s5068_s8 + $0x2] sm:$0x3] }
 0x463   :  { %v1700_v62 = vadd.f32 %v1698_v57, %v1607_v56  ;;  %v1606_v63 = vadd.f32 %v1604_v59, %v1513_v52  ;;  %v1791_v1 = vmul.f32 %v3866_v31, %v1787_v51  ;;  %v1884_v8 = vmul.f32 %v3871_v61, %v1880_v0  ;;  %2062 = vmatpush1.bf16.msra.mxu1 %v3478_v39  ;;  %v3896_v0 = vld [vmem:[%s5069_s9 + $0x30] sm:$0xff]  }
 0x464   :  { %v1775_v55 = vpop.f32.mrf.mxu0  ;;  %v1868_v60 = vpop.f32.mrf.mxu1  ;;  %v3482_v54 = vcombine.high %v2222_v50, %v2223_v53  ;;  %2270 = vmatprep.subr.bf16.mxu0 %v3484_v44  ;;  %v3481_v48 = vcombine.low %v2222_v50, %v2223_v53  ;;  %v3520_v39 = vcombine.low %v4683_v32, %v4688_v37  ;;  %v2235_v50 = vrot.slane %v2226_v42, %v4228_v41  ;;  %v3921_v37 = vld [vmem:[%s5069_s9 + $0x178] sm:$0xff]  }
 0x465   :  { %v1699_v2 = vadd.f32 %v1697_v58, %v1606_v63  ;;  %v1790_v3 = vmul.f32 %v1785_v49, %v1775_v55  ;;  %v1793_v5 = vadd.f32 %v1791_v1, %v1700_v62  ;;  %v1883_v7 = vmul.f32 %v1878_v4, %v1868_v60  ;;  %v3889_v1 = vld [vmem:[%s5069_s9 + $0xf8] sm:$0xff]   ;;  %v3895_v4 = vld [vmem:[%s5069_s9 + $0x70] sm:$0xff]  }
 0x466   :  { %v3477_v49 = vcombine.high %v2010_v43, %v2011_v45  ;;  %v3891_v55 = vld [vmem:[%s5069_s9 + $0x78] sm:$0xff]   ;;  %v2019_v43 = vrot.slane %v2014_v40, %v4219_v35  ;;  %v2231_v45 = vrot.slane %v2226_v42, %v4219_v35 }
 0x467   :  { %v1792_v6 = vadd.f32 %v1790_v3, %v1699_v2  ;;  %v1886_v9 = vadd.f32 %v1884_v8, %v1793_v5  ;;  %v3890_v60 = vld [vmem:[%s5069_s9 + $0xb8] sm:$0xff]   ;;  %v3893_v3 = vld [vmem:[%s5069_s9 + $0xf0] sm:$0xff]   ;;  %v3898_v8 = vld [vmem:[%s5069_s9 + $0xa8] sm:$0xff]  }
 0x468   :  { %2063 = vmatprep.subr.bf16.mxu1 %v3477_v49  ;;  %v3892_v2 = vld [vmem:[%s5069_s9 + $0x38] sm:$0xff]   ;;  %v3894_v5 = vld [vmem:[%s5069_s9 + $0xb0] sm:$0xff]   ;;  %v2023_v49 = vrot.slane %v2014_v40, %v4228_v41 }
 0x469   :  { %v1885_v28 = vadd.f32 %v1883_v7, %v1792_v6  ;;  %2064 = vmatpush1.bf16.msra.mxu1 %v3476_v29  ;;  %v3897_v6 = vld [vmem:[%s5069_s9 + $0xe8] sm:$0xff]  }
 0x46a   :  { %3645 = vmatprep.subr.bf16.mxu1 %v3889_v1  ;;  %v3899_v7 = vld [vmem:[%s5069_s9 + $0x68] sm:$0xff]  }
 0x46b   :  { %3880 = vmatprep.mubr.msk.f32.mxu0 %vm42_vm0, %v1885_v28  ;;  %v3900_v28 = vld [vmem:[%s5069_s9 + $0x28] sm:$0xff]  }
 0x46c   :  { %3881 = vmatmul.mubr.msk.f32.vlgmr.msra.gmra.mxu0 %vm42_vm0, %v1886_v9  ;;  %v3901_v9 = vld [vmem:[%s5069_s9 + $0xe0] sm:$0xff]  }
 0x46d   :  { %2290 = vmatprep.mubr.bf16.mxu0 %v4087_v46  ;;  %2271 = vmatpush1.bf16.msra.mxu0 %v3483_v47 }
 0x46e   :  { %2272 = vmatprep.subr.bf16.mxu0 %v3482_v54 }
 0x471   :  { %2273 = vmatpush1.bf16.msra.mxu0 %v3481_v48 }
 0x472   :  { %3667 = vmatprep.subr.bf16.mxu0 %v3891_v55 }
 0x52c   :  { %v3882_v10 = vpop.f32.mrf.mxu0 }
 0x52d   :  { %v1973_v13 = vadd.f32 %v4061_v12, %v3882_v10  ;;  %v3903_v10 = vld [vmem:[%s5069_s9 + $0x60] sm:$0xff]  }
 0x52e   :  { %v1963_v14 = vpop.f32.mrf.mxu0  ;;  %v3904_v12 = vld [vmem:[%s5069_s9 + $0x20] sm:$0xff]  }
 0x52f   :  { %v4537_v15 = vadd.f32 %v3475_v11, %v1973_v13  ;;  %v1972_v17 = vadd.f32 %v4062_v16, %v1963_v14  ;;  %v3905_v13 = vld [vmem:[%s5069_s9 + $0xd8] sm:$0xff]  }
 0x530   :  { %v3907_v14 = vld [vmem:[%s5069_s9 + $0x58] sm:$0xff]  }
 0x531   :  { %v4542_v18 = vadd.f32 %v3475_v11, %v1972_v17  ;;  %v1986_v19 = vsel %vm42_vm0, %v4537_v15, 0.0  ;;  %v3902_v11 = vld [vmem:[%s5069_s9 + $0xa0] sm:$0xff]   ;;  %v3906_v16 = vld [vmem:[%s5069_s9 + $0x98] sm:$0xff]  }
 0x532   :  { %1987 = vadd.xlane.f32.xlu1 %v1986_v19  ;;  %v3908_v17 = vld [vmem:[%s5069_s9 + $0x18] sm:$0xff]   ;;  %v3909_v19 = vld [vmem:[%s5069_s9 + $0xd0] sm:$0xff]  }
 0x533   :  { %v1983_v20 = vsel %vm42_vm0, %v4542_v18, 0.0 }
 0x534   :  { %1984 = vadd.xlane.f32.xlu0 %v1983_v20  ;;  %v3911_v20 = vld [vmem:[%s5069_s9 + $0x50] sm:$0xff]  }
 0x5bb   :  { %v1988_v21 = vpop.xlane.xlu1 %1987 }
 0x5bc   :  { %v1990_v22 = vmul.f32 0.03125, %v1988_v21  ;;  %v3910_v21 = vld [vmem:[%s5069_s9 + $0x90] sm:$0xff]  }
 0x5bd   :  { %v1985_v23 = vpop.xlane.xlu0 %1984 }
 0x5be   :  { %v1989_v24 = vmul.f32 0.03125, %v1985_v23  ;;  %v1992_v25 = vsub.f32 %v4537_v15, %v1990_v22  ;;  %v3912_v22 = vld [vmem:[%s5069_s9 + $0x10] sm:$0xff]   ;;  %v3913_v23 = vld [vmem:[%s5069_s9 + $0xc8] sm:$0xff]  }
 0x5c0   :  { %v1991_v26 = vsub.f32 %v4542_v18, %v1989_v24  ;;  %v1994_v34 = vmul.f32 %v1992_v25, %v1992_v25  ;;  %v3915_v24 = vld [vmem:[%s5069_s9 + $0x48] sm:$0xff]  }
 0x5c2   :  { %v1993_v27 = vmul.f32 %v1991_v26, %v1991_v26  ;;  %v1998_v36 = vsel %vm42_vm0, %v1994_v34, 0.0  ;;  %v3918_v34 = vld [vmem:[%s5069_s9 + $0x80] sm:$0xff]  }
 0x5c4   :  { %v1995_v30 = vsel %vm42_vm0, %v1993_v27, 0.0  ;;  %v3917_v27 = vld [vmem:[%s5069_s9 + $0xc0] sm:$0xff]  }
 0x5c5   :  { %1996 = vadd.xlane.f32.xlu0 %v1995_v30  ;;  %v3919_v30 = vld [vmem:[%s5069_s9 + $0x40] sm:$0xff]  }
 0x5c9   :  { %1999 = vadd.xlane.f32.xlu0 %v1998_v36  ;;  %v3920_v36 = vld [vmem:[%s5069_s9] sm:$0xff]  }
 0x64e   :  { %v1997_v33 = vpop.xlane.xlu0 %1996 }
 0x64f   :  { %v2001_v51 = vmul.f32 0.03125, %v1997_v33 }
 0x651   :  { %v2003_v52 = vadd.f32 1e-05, %v2001_v51 }
 0x652   :  { %v2000_v56 = vpop.xlane.xlu0 %1999 }
 0x653   :  { %v2002_v57 = vmul.f32 0.03125, %v2000_v56  ;;  %3993 = vrsqrt.f32 %v2003_v52 }
 0x655   :  { %v2004_v59 = vadd.f32 1e-05, %v2002_v57 }
 0x657   :  { %3995 = vrsqrt.f32 %v2004_v59 }
 0x660   :  { %v3994_v31 = vpop.eup %3993 }
 0x661   :  { %v2007_v62 = vmul.f32 %v3994_v31, %v1991_v26  ;;  %v3916_v26 = vld [vmem:[%s5069_s9 + $0x8] sm:$0xff]  }
 0x664   :  { %v3996_v61 = vpop.eup %3995 }
 0x665   :  { %v2008_v63 = vmul.f32 %v3996_v61, %v1992_v25  ;;  %v3914_v25 = vld [vmem:[%s5069_s9 + $0x88] sm:$0xff]  }
 0x667   :  { %v4578_v58 = vpack.c.bf16 %v2008_v63, %v2007_v62 }
 0x669   :  { %3480 = vmatmul.mubr.msk.bf16.vlgmr.msra.gmra.mxu1 %vm42_vm0, %v4578_v58  ;;  %3485 = vmatmul.mubr.msk.bf16.vlgmr.msra.gmra.mxu0 %vm42_vm0, %v4578_v58 }
 0x66a   :  { %3646 = vmatpush3.bf16.msra.mxu1 %v3890_v60  ;;  %3668 = vmatpush3.bf16.msra.mxu0 %v3892_v2 }
 0x66b   :  { %3647 = vmatprep.subr.bf16.mxu1 %v3893_v3  ;;  %3669 = vmatprep.subr.bf16.mxu0 %v3895_v4 }
 0x66e   :  { %3648 = vmatpush3.bf16.msra.mxu1 %v3894_v5  ;;  %3670 = vmatpush3.bf16.msra.mxu0 %v3896_v0 }
 0x66f   :  { %3649 = vmatprep.subr.bf16.mxu1 %v3897_v6  ;;  %3671 = vmatprep.subr.bf16.mxu0 %v3899_v7 }
 0x672   :  { %3650 = vmatpush3.bf16.msra.mxu1 %v3898_v8  ;;  %3672 = vmatpush3.bf16.msra.mxu0 %v3900_v28 }
 0x673   :  { %3651 = vmatprep.subr.bf16.mxu1 %v3901_v9  ;;  %3673 = vmatprep.subr.bf16.mxu0 %v3903_v10 }
 0x676   :  { %3652 = vmatpush3.bf16.msra.mxu1 %v3902_v11  ;;  %3674 = vmatpush3.bf16.msra.mxu0 %v3904_v12 }
 0x677   :  { %3653 = vmatprep.subr.bf16.mxu1 %v3905_v13  ;;  %3675 = vmatprep.subr.bf16.mxu0 %v3907_v14 }
 0x67a   :  { %3654 = vmatpush3.bf16.msra.mxu1 %v3906_v16  ;;  %3676 = vmatpush3.bf16.msra.mxu0 %v3908_v17 }
 0x67b   :  { %3655 = vmatprep.subr.bf16.mxu1 %v3909_v19  ;;  %3677 = vmatprep.subr.bf16.mxu0 %v3911_v20 }
 0x67e   :  { %3656 = vmatpush3.bf16.msra.mxu1 %v3910_v21  ;;  %3678 = vmatpush3.bf16.msra.mxu0 %v3912_v22 }
 0x67f   :  { %3657 = vmatprep.subr.bf16.mxu1 %v3913_v23  ;;  %3679 = vmatprep.subr.bf16.mxu0 %v3915_v24 }
 0x682   :  { %3658 = vmatpush3.bf16.msra.mxu1 %v3914_v25  ;;  %3680 = vmatpush3.bf16.msra.mxu0 %v3916_v26 }
 0x683   :  { %3659 = vmatprep.subr.bf16.mxu1 %v3917_v27  ;;  %3681 = vmatprep.subr.bf16.mxu0 %v3919_v30 }
 0x686   :  { %3660 = vmatpush3.bf16.msra.mxu1 %v3918_v34  ;;  %3682 = vmatpush3.bf16.msra.mxu0 %v3920_v36 }
 0x687   :  { %2753 = vmatprep.subr.bf16.mxu1 %v3521_v38  ;;  %3689 = vmatprep.subr.bf16.mxu0 %v3921_v37 }
 0x729   :  { %v2083_v47 = vpop.f32.mrf.mxu1  ;;  %v2292_v44 = vpop.f32.mrf.mxu0 }
 0x72a   :  { %v4704_v53 = vadd.f32 %v2083_v47, %v2019_v43  ;;  %v4706_v54 = vadd.f32 %v2292_v44, %v2231_v45 }
 0x72b   :  { %v2085_v29 = vpop.f32.mrf.mxu1  ;;  %v2294_v48 = vpop.f32.mrf.mxu0 }
 0x72c   :  { %v2092_v33 = vand.u32 2147483647, %v4704_v53  ;;  %v2301_v51 = vand.u32 2147483647, %v4706_v54  ;;  %v4710_v52 = vadd.f32 %v2085_v29, %v2023_v49  ;;  %v4712_v56 = vadd.f32 %v2294_v48, %v2235_v50 }
 0x72d   :  { %v2087_v57 = vpop.f32.mrf.mxu1  ;;  %v2296_v60 = vpop.f32.mrf.mxu0  ;;  %vm2172_vm3 = vcmp.ge.f32.partialorder %v4704_v53, 0.0  ;;  %vm2381_vm8 = vcmp.ge.f32.partialorder %v4706_v54, 0.0 }
 0x72e   :  { %v2096_v59 = vmul.f32 0.70710677, %v2092_v33  ;;  %v2305_v31 = vmul.f32 0.70710677, %v2301_v51  ;;  %v4714_v61 = vadd.f32 %v2087_v57, %v2019_v43  ;;  %v2093_v62 = vand.u32 2147483647, %v4710_v52 }
 0x72f   :  { %v2302_v63 = vand.u32 2147483647, %v4712_v56  ;;  %v2089_v6 = vpop.f32.mrf.mxu1  ;;  %v4722_v28 = vadd.f32 %v2296_v60, %v2231_v45  ;;  %v2298_v16 = vpop.f32.mrf.mxu0  ;;  %vm2173_vm4 = vcmp.ge.f32.partialorder %v4710_v52, 0.0  ;;  %vm2382_vm7 = vcmp.ge.f32.partialorder %v4712_v56, 0.0 }
 0x730   :  { %v2100_v1 = vmul.f32 0.3275911, %v2096_v59  ;;  %v2309_v55 = vmul.f32 0.3275911, %v2305_v31  ;;  %v2097_v2 = vmul.f32 0.70710677, %v2093_v62  ;;  %v4724_v11 = vadd.f32 %v2089_v6, %v2023_v49 }
 0x731   :  { %v4718_v3 = vmul.f32 0.70710677, %v2302_v63  ;;  %v2094_v4 = vand.u32 2147483647, %v4714_v61  ;;  %v2303_v14 = vand.u32 2147483647, %v4722_v28  ;;  %v4728_v21 = vadd.f32 %v2298_v16, %v2235_v50 }
 0x732   :  { %v2104_v5 = vadd.f32 1.0, %v2100_v1  ;;  %v2313_v0 = vadd.f32 1.0, %v2309_v55  ;;  %v2101_v7 = vmul.f32 0.3275911, %v2097_v2  ;;  %v2095_v20 = vand.u32 2147483647, %v4724_v11 }
 0x733   :  { %v2310_v8 = vmul.f32 0.3275911, %v4718_v3  ;;  %v2098_v9 = vmul.f32 0.70710677, %v2094_v4  ;;  %v2307_v19 = vmul.f32 0.70710677, %v2303_v14 }
 0x734   :  { %3997 = vrcp.f32 %v2104_v5  ;;  %v2105_v10 = vadd.f32 1.0, %v2101_v7  ;;  %v2099_v23 = vmul.f32 0.70710677, %v2095_v20  ;;  %v2152_v24 = vsub.f32 0.0, %v2096_v59 }
 0x735   :  { %3999 = vrcp.f32 %v2313_v0  ;;  %v2314_v12 = vadd.f32 1.0, %v2310_v8  ;;  %v2102_v13 = vmul.f32 0.3275911, %v2098_v9  ;;  %v2311_v22 = vmul.f32 0.3275911, %v2307_v19 }
 0x736   :  { %4001 = vrcp.f32 %v2105_v10  ;;  %v2304_v25 = vand.u32 2147483647, %v4728_v21  ;;  %v2103_v27 = vmul.f32 0.3275911, %v2099_v23  ;;  %v2361_v34 = vsub.f32 0.0, %v2305_v31 }
 0x737   :  { %v2106_v17 = vadd.f32 1.0, %v2102_v13  ;;  %4003 = vrcp.f32 %v2314_v12  ;;  %v2315_v26 = vadd.f32 1.0, %v2311_v22  ;;  %v2156_v38 = vmul.f32 %v2152_v24, %v2096_v59 }
 0x738   :  { %v4731_v30 = vmul.f32 0.70710677, %v2304_v25  ;;  %v2107_v36 = vadd.f32 1.0, %v2103_v27  ;;  %v2153_v43 = vsub.f32 0.0, %v2097_v2  ;;  %v2365_v50 = vmul.f32 %v2361_v34, %v2305_v31 }
 0x739   :  { %4005 = vrcp.f32 %v2106_v17  ;;  %v2154_v29 = vsub.f32 0.0, %v2098_v9  ;;  %v2160_v33 = vmul.f32 1.442695, %v2156_v38  ;;  %v2363_v62 = vsub.f32 0.0, %v2307_v19 }
 0x73a   :  { %4007 = vrcp.f32 %v2315_v26  ;;  %v2312_v40 = vmul.f32 0.3275911, %v4731_v30  ;;  %v2157_v59 = vmul.f32 %v2153_v43, %v2097_v2  ;;  %v2369_v4 = vmul.f32 1.442695, %v2365_v50 }
 0x73b   :  { %4009 = vrcp.f32 %v2107_v36  ;;  %v2362_v31 = vsub.f32 0.0, %v4718_v3  ;;  %v2158_v5 = vmul.f32 %v2154_v29, %v2098_v9  ;;  %v2367_v12 = vmul.f32 %v2363_v62, %v2307_v19 }
 0x73c   :  { %v2316_v44 = vadd.f32 1.0, %v2312_v40  ;;  %v2162_v10 = vmul.f32 1.442695, %v2157_v59  ;;  %v2155_v13 = vsub.f32 0.0, %v2099_v23  ;;  %vm2174_vm1 = vcmp.ge.f32.partialorder %v4714_v61, 0.0 }
 0x73d   :  { %v2366_v22 = vmul.f32 %v2362_v31, %v4718_v3  ;;  %v2164_v24 = vmul.f32 1.442695, %v2158_v5  ;;  %v2373_v38 = vmul.f32 1.442695, %v2367_v12  ;;  %v2364_v3 = vsub.f32 0.0, %v4731_v30 }
 0x73e   :  { %4011 = vrcp.f32 %v2316_v44  ;;  %v2159_v40 = vmul.f32 %v2155_v13, %v2099_v23  ;;  %vm2175_vm5 = vcmp.ge.f32.partialorder %v4724_v11, 0.0  ;;  %vm2383_vm6 = vcmp.ge.f32.partialorder %v4722_v28, 0.0 }
 0x73f   :  { %4013 = vpow2.f32 %v2160_v33  ;;  %v2371_v29 = vmul.f32 1.442695, %v2366_v22  ;;  %vm2384_vm9 = vcmp.ge.f32.partialorder %v4728_v21, 0.0 }
 0x740   :  { %4015 = vpow2.f32 %v2369_v4 }
 0x741   :  { %v4734_v42 = vpop.eup %3997  ;;  %4017 = vpow2.f32 %v2162_v10 }
 0x742   :  { %v4736_v45 = vpop.eup %3999  ;;  %v2112_v47 = vmul.f32 1.0614054, %v4734_v42  ;;  %4019 = vpow2.f32 %v2164_v24 }
 0x743   :  { %v2321_v49 = vmul.f32 1.0614054, %v4736_v45  ;;  %v4740_v51 = vpop.eup %4001  ;;  %4021 = vpow2.f32 %v2373_v38 }
 0x744   :  { %v2116_v48 = vadd.f32 -1.4531521, %v2112_v47  ;;  %v2113_v1 = vmul.f32 1.0614054, %v4740_v51  ;;  %v4744_v55 = vpop.eup %4003  ;;  %4023 = vpow2.f32 %v2371_v29 }
 0x745   :  { %v2325_v57 = vadd.f32 -1.4531521, %v2321_v49  ;;  %v2322_v7 = vmul.f32 1.0614054, %v4744_v55 }
 0x746   :  { %v2120_v63 = vmul.f32 %v4734_v42, %v2116_v48  ;;  %v2117_v6 = vadd.f32 -1.4531521, %v2113_v1  ;;  %v4749_v2 = vpop.eup %4005  ;;  %v2166_v1 = vmul.f32 1.442695, %v2159_v40 }
 0x747   :  { %v2329_v60 = vmul.f32 %v4736_v45, %v2325_v57  ;;  %v2326_v17 = vadd.f32 -1.4531521, %v2322_v7  ;;  %v2114_v20 = vmul.f32 1.0614054, %v4749_v2  ;;  %v4756_v25 = vpop.eup %4007 }
 0x748   :  { %v2124_v0 = vadd.f32 1.4214138, %v2120_v63  ;;  %v2121_v16 = vmul.f32 %v4740_v51, %v2117_v6  ;;  %v2323_v36 = vmul.f32 1.0614054, %v4756_v25  ;;  %v4763_v49 = vpop.eup %4009  ;;  %4025 = vpow2.f32 %v2166_v1 }
 0x749   :  { %v2333_v8 = vadd.f32 1.4214138, %v2329_v60  ;;  %v2330_v19 = vmul.f32 %v4744_v55, %v2326_v17  ;;  %v2118_v34 = vadd.f32 -1.4531521, %v2114_v20  ;;  %v2115_v63 = vmul.f32 1.0614054, %v4763_v49 }
 0x74a   :  { %v2128_v14 = vmul.f32 %v4734_v42, %v2124_v0  ;;  %v2125_v27 = vadd.f32 1.4214138, %v2121_v16  ;;  %v2327_v48 = vadd.f32 -1.4531521, %v2323_v36  ;;  %v2368_v0 = vmul.f32 %v2364_v3, %v4731_v30 }
 0x74b   :  { %v2337_v9 = vmul.f32 %v4736_v45, %v2333_v8  ;;  %v2334_v47 = vadd.f32 1.4214138, %v2330_v19  ;;  %v2122_v44 = vmul.f32 %v4749_v2, %v2118_v34  ;;  %v4769_v60 = vpop.eup %4011  ;;  %v2119_v8 = vadd.f32 -1.4531521, %v2115_v63 }
 0x74c   :  { %v2132_v26 = vadd.f32 -0.28449672, %v2128_v14  ;;  %v2129_v43 = vmul.f32 %v4740_v51, %v2125_v27  ;;  %v2331_v23 = vmul.f32 %v4756_v25, %v2327_v48  ;;  %v2324_v10 = vmul.f32 1.0614054, %v4769_v60  ;;  %v4014_v17 = vpop.eup %4013 }
 0x74d   :  { %v2341_v50 = vadd.f32 -0.28449672, %v2337_v9  ;;  %v2338_v59 = vmul.f32 %v4744_v55, %v2334_v47  ;;  %v2126_v62 = vadd.f32 1.4214138, %v2122_v44  ;;  %v2123_v9 = vmul.f32 %v4763_v49, %v2119_v8  ;;  %v4016_v38 = vpop.eup %4015 }
 0x74e   :  { %v2136_v33 = vmul.f32 %v4734_v42, %v2132_v26  ;;  %v2133_v57 = vadd.f32 -0.28449672, %v2129_v43  ;;  %v2335_v7 = vadd.f32 1.4214138, %v2331_v23  ;;  %v2328_v22 = vadd.f32 -1.4531521, %v2324_v10 }
 0x74f   :  { %v2342_v31 = vadd.f32 -0.28449672, %v2338_v59  ;;  %v2130_v5 = vmul.f32 %v4749_v2, %v2126_v62  ;;  %v2345_v6 = vmul.f32 %v4736_v45, %v2341_v50  ;;  %v2375_v26 = vmul.f32 1.442695, %v2368_v0 }
 0x750   :  { %v2137_v4 = vmul.f32 %v4740_v51, %v2133_v57  ;;  %v2140_v12 = vadd.f32 0.2548296, %v2136_v33  ;;  %v2339_v20 = vmul.f32 %v4756_v25, %v2335_v7  ;;  %v2127_v34 = vadd.f32 1.4214138, %v2123_v9 }
 0x751   :  { %v2346_v14 = vmul.f32 %v4744_v55, %v2342_v31  ;;  %v2134_v16 = vadd.f32 -0.28449672, %v2130_v5  ;;  %v2332_v36 = vmul.f32 %v4769_v60, %v2328_v22  ;;  %v2349_v43 = vadd.f32 0.2548296, %v2345_v6 }
 0x752   :  { %v2141_v13 = vadd.f32 0.2548296, %v2137_v4  ;;  %v2343_v19 = vadd.f32 -0.28449672, %v2339_v20  ;;  %v2144_v40 = vmul.f32 %v4734_v42, %v2140_v12  ;;  %v2131_v3 = vmul.f32 %v4763_v49, %v2127_v34 }
 0x753   :  { %v2138_v24 = vmul.f32 %v4749_v2, %v2134_v16  ;;  %v2350_v27 = vadd.f32 0.2548296, %v2346_v14  ;;  %v2336_v50 = vadd.f32 1.4214138, %v2332_v36  ;;  %4027 = vpow2.f32 %v2375_v26 }
 0x754   :  { %v2145_v30 = vmul.f32 %v4740_v51, %v2141_v13  ;;  %v2347_v44 = vmul.f32 %v4756_v25, %v2343_v19  ;;  %v4018_v51 = vpop.eup %4017  ;;  %v2135_v59 = vadd.f32 -0.28449672, %v2131_v3  ;;  %v2148_v23 = vmul.f32 0.5, %v2144_v40 }
 0x755   :  { %v2142_v47 = vadd.f32 0.2548296, %v2138_v24  ;;  %v2354_v33 = vmul.f32 %v4744_v55, %v2350_v27  ;;  %v4020_v62 = vpop.eup %4019  ;;  %v2353_v42 = vmul.f32 %v4736_v45, %v2349_v43  ;;  %v2340_v31 = vmul.f32 %v4769_v60, %v2336_v50 }
 0x756   :  { %v2149_v29 = vmul.f32 0.5, %v2145_v30  ;;  %v2351_v57 = vadd.f32 0.2548296, %v2347_v44  ;;  %v2139_v4 = vmul.f32 %v4763_v49, %v2135_v59  ;;  %v4022_v5 = vpop.eup %4021  ;;  %v2168_v10 = vmul.f32 %v4014_v17, %v2148_v23 }
 0x757   :  { %v2146_v48 = vmul.f32 %v4749_v2, %v2142_v47  ;;  %v2358_v2 = vmul.f32 0.5, %v2354_v33  ;;  %v2344_v8 = vadd.f32 -0.28449672, %v2340_v31  ;;  %v2357_v12 = vmul.f32 0.5, %v2353_v42  ;;  %v4024_v14 = vpop.eup %4023 }
 0x758   :  { %v2355_v1 = vmul.f32 %v4756_v25, %v2351_v57  ;;  %v2169_v0 = vmul.f32 %v4018_v51, %v2149_v29  ;;  %v2143_v55 = vadd.f32 0.2548296, %v2139_v4  ;;  %v4026_v20 = vpop.eup %4025  ;;  %v2176_v26 = vsub.f32 1.0, %v2168_v10 }
 0x759   :  { %v2150_v63 = vmul.f32 0.5, %v2146_v48  ;;  %v2348_v45 = vmul.f32 %v4769_v60, %v2344_v8  ;;  %v2378_v22 = vmul.f32 %v4024_v14, %v2358_v2  ;;  %v2377_v27 = vmul.f32 %v4016_v38, %v2357_v12  ;;  %v3053_v2 = vld [vmem:[%s5067_s7 + $0x18] sm:$0xff]  ;;  %v3929_v14 = vld [vmem:[%s5069_s9 + $0x160] sm:$0xff]  }
 0x75a   :  { %v2359_v7 = vmul.f32 0.5, %v2355_v1  ;;  %v2147_v13 = vmul.f32 %v4763_v49, %v2143_v55  ;;  %v2177_v9 = vsub.f32 1.0, %v2169_v0  ;;  %v2180_v3 = vsel %vm2172_vm3, %v2176_v26, %v2168_v10  ;;  %v3923_v10 = vld [vmem:[%s5069_s9 + $0x170] sm:$0xff]   ;;  %v3926_v12 = vld [vmem:[%s5069_s9 + $0x1f8] sm:$0xff]  }
 0x75b   :  { %v2170_v6 = vmul.f32 %v4020_v62, %v2150_v63  ;;  %v2352_v24 = vadd.f32 0.2548296, %v2348_v45  ;;  %v2386_v40 = vsub.f32 1.0, %v2378_v22  ;;  %v2385_v50 = vsub.f32 1.0, %v2377_v27  ;;  %v3928_v45 = vld [vmem:[%s5069_s9 + $0x1b8] sm:$0xff]   ;;  %v3937_v26 = vld [vmem:[%s5069_s9 + $0x150] sm:$0xff]  }
 0x75c   :  { %v2379_v25 = vmul.f32 %v4022_v5, %v2359_v7  ;;  %v2151_v30 = vmul.f32 0.5, %v2147_v13  ;;  %v2181_v36 = vsel %vm2173_vm4, %v2177_v9, %v2169_v0  ;;  %v2184_v57 = vmul.f32 %v2180_v3, %v4704_v53  ;;  %v2705_v53 = vld [vmem:[%s5067_s7 + $0x10] sm:$0xff]  ;;  %v3054_v7 = vld [vmem:[%s5067_s7 + $0x38] sm:$0xff]  ;;  %v3927_v13 = vld [vmem:[%s5069_s9 + $0x128] sm:$0xff]  }
 0x75d   :  { %v2178_v16 = vsub.f32 1.0, %v2170_v6  ;;  %v2356_v17 = vmul.f32 %v4769_v60, %v2352_v24  ;;  %v2185_v29 = vmul.f32 %v2181_v36, %v4710_v52  ;;  %v2390_v59 = vsel %vm2382_vm7, %v2386_v40, %v2378_v22  ;;  %v3933_v9 = vld [vmem:[%s5069_s9 + $0x158] sm:$0xff]   ;;  %v3934_v22 = vld [vmem:[%s5069_s9 + $0x1e8] sm:$0xff]   ;;  %v3948_v3 = vld [vmem:[%s5069_s9 + $0x190] sm:$0xff]  }
 0x75e   :  { %v2171_v19 = vmul.f32 %v4026_v20, %v2151_v30  ;;  %v2387_v34 = vsub.f32 1.0, %v2379_v25  ;;  %v2389_v23 = vsel %vm2381_vm8, %v2385_v50, %v2377_v27  ;;  %v2394_v52 = vmul.f32 %v2390_v59, %v4712_v56  ;;  %v3055_v56 = vld [vmem:[%s5067_s7 + $0x58] sm:$0xff]  ;;  %v3932_v20 = vld [vmem:[%s5069_s9 + $0x1b0] sm:$0xff]   ;;  %v3936_v24 = vld [vmem:[%s5069_s9 + $0x1a8] sm:$0xff]  }
 0x75f   :  { %v2182_v49 = vsel %vm2174_vm1, %v2178_v16, %v2170_v6  ;;  %v2360_v47 = vmul.f32 0.5, %v2356_v17  ;;  %v2393_v31 = vmul.f32 %v2389_v23, %v4706_v54  ;;  %v3540_v8 = vcombine.high %v3053_v2, %v3054_v7  ;;  %v3930_v16 = vld [vmem:[%s5069_s9 + $0x1f0] sm:$0xff]   ;;  %v3935_v30 = vld [vmem:[%s5069_s9 + $0x118] sm:$0xff]   ;;  %v3938_v27 = vld [vmem:[%s5069_s9 + $0x1e0] sm:$0xff]  }
 0x760   :  { %v2179_v43 = vsub.f32 1.0, %v2171_v19  ;;  %v4028_v44 = vpop.eup %4027  ;;  %v2186_v38 = vmul.f32 %v2182_v49, %v4714_v61  ;;  %v2391_v48 = vsel %vm2383_vm6, %v2387_v34, %v2379_v25  ;;  %v3539_v32 = vcombine.low %v3053_v2, %v3054_v7  ;;  %v3931_v25 = vld [vmem:[%s5069_s9 + $0x120] sm:$0xff]   ;;  %v3941_v49 = vld [vmem:[%s5069_s9 + $0x148] sm:$0xff]   ;;  %v3942_v34 = vld [vmem:[%s5069_s9 + $0x1d8] sm:$0xff]  }
 0x761   :  { %v2380_v51 = vmul.f32 %v4028_v44, %v2360_v47  ;;  %v2395_v63 = vmul.f32 %v2391_v48, %v4722_v28  ;;  %v3940_v17 = vld [vmem:[%s5069_s9 + $0x1a0] sm:$0xff]   ;;  %v3943_v36 = vld [vmem:[%s5069_s9 + $0x108] sm:$0xff]   ;;  %v3944_v40 = vld [vmem:[%s5069_s9 + $0x198] sm:$0xff]  }
 0x762   :  { %v2183_v60 = vsel %vm2175_vm5, %v2179_v43, %v2171_v19  ;;  %v2188_v42 = vpack.c.bf16 %v2186_v38, %v2184_v57  ;;  %v3939_v19 = vld [vmem:[%s5069_s9 + $0x110] sm:$0xff]   ;;  %v3945_v43 = vld [vmem:[%s5069_s9 + $0x140] sm:$0xff]   ;;  %v3949_v50 = vld [vmem:[%s5069_s9 + $0x1c8] sm:$0xff]  }
 0x763   :  { %v2187_v33 = vmul.f32 %v2183_v60, %v4724_v11  ;;  %v2388_v62 = vsub.f32 1.0, %v2380_v51  ;;  %v2706_v11 = vld [vmem:[%s5067_s7 + $0x30] sm:$0xff]  ;;  %v2397_v0 = vpack.c.bf16 %v2395_v63, %v2393_v31  ;;  %v3947_v44 = vld [vmem:[%s5069_s9 + $0x100] sm:$0xff]   ;;  %v3950_v38 = vld [vmem:[%s5069_s9 + $0x188] sm:$0xff]  }
 0x764   :  { %v3519_v28 = vcombine.high %v2705_v53, %v2706_v11  ;;  %v3518_v6 = vcombine.low %v2705_v53, %v2706_v11  ;;  %v3946_v47 = vld [vmem:[%s5069_s9 + $0x1d0] sm:$0xff]   ;;  %v3951_v60 = vld [vmem:[%s5069_s9 + $0x1c0] sm:$0xff]  }
 0x765   :  { %v2189_v61 = vpack.c.bf16 %v2187_v33, %v2185_v29  ;;  %v2392_v1 = vsel %vm2384_vm9, %v2388_v62, %v2380_v51  ;;  %v3952_v51 = vld [vmem:[%s5069_s9 + $0x180] sm:$0xff]  }
 0x766   :  { %v2396_v4 = vmul.f32 %v2392_v1, %v4728_v21  ;;  %v3056_v21 = vld [vmem:[%s5067_s7 + $0x78] sm:$0xff]  ;;  %v2709_v33 = vld [vmem:[%s5068_s8 + $0x4] sm:$0x3]  ;;  %v3057_v11 = vld [vmem:[%s5068_s8 + $0x6] sm:$0x3] }
 0x767   :  { %2696 = vmatprep.mubr.bf16.mxu0 %v2189_v61  ;;  %v3542_v54 = vcombine.high %v3055_v56, %v3056_v21  ;;  %v3541_v55 = vcombine.low %v3055_v56, %v3056_v21  ;;  %v2714_v62 = vrot.slane %v2709_v33, %v4219_v35  ;;  %v3062_v21 = vrot.slane %v3057_v11, %v4219_v35 }
 0x768   :  { %2697 = vmatmul.mubr.bf16.vlgmr.msra.gmra.mxu0 %v2188_v42  ;;  %v2398_v5 = vpack.c.bf16 %v2396_v4, %v2394_v52  ;;  %v2718_v42 = vrot.slane %v2709_v33, %v4228_v41  ;;  %v3066_v37 = vrot.slane %v3057_v11, %v4228_v41 }
 0x76a   :  { %2559 = vmatprep.mubr.bf16.mxu1 %v2398_v5 }
 0x76b   :  { %2560 = vmatmul.mubr.bf16.vlgmr.msra.gmra.mxu1 %v2397_v0 }
 0x76c   :  { %2754 = vmatpush1.bf16.msra.mxu1 %v3520_v39  ;;  %2773 = vmatprep.mubr.bf16.mxu1 %v4087_v46  ;;  %v3922_v39 = vld [vmem:[%s5069_s9 + $0x138] sm:$0xff]  }
 0x76d   :  { %2755 = vmatprep.subr.bf16.mxu1 %v3519_v28  ;;  %3690 = vmatpush3.bf16.msra.mxu0 %v3922_v39 }
 0x76e   :  { %3691 = vmatprep.subr.bf16.mxu0 %v3923_v10 }
 0x770   :  { %2756 = vmatpush1.bf16.msra.mxu1 %v3518_v6 }
 0x771   :  { %3101 = vmatprep.subr.bf16.mxu1 %v3542_v54 }
 0x773   :  { %3522 = vmatmul.mubr.msk.bf16.vlgmr.msra.gmra.mxu1 %vm42_vm0, %v4578_v58 }
 0x774   :  { %3102 = vmatpush1.bf16.msra.mxu1 %v3541_v55  ;;  %3121 = vmatprep.mubr.bf16.mxu1 %v4087_v46  ;;  %v3924_v46 = vld [vmem:[%s5069_s9 + $0x130] sm:$0xff]  }
 0x775   :  { %3103 = vmatprep.subr.bf16.mxu1 %v3540_v8  ;;  %3692 = vmatpush3.bf16.msra.mxu0 %v3924_v46 }
 0x778   :  { %3104 = vmatpush1.bf16.msra.mxu1 %v3539_v32 }
 0x779   :  { %3711 = vmatprep.subr.bf16.mxu1 %v3926_v12 }
 0x77b   :  { %3543 = vmatmul.mubr.msk.bf16.vlgmr.msra.gmra.mxu1 %vm42_vm0, %v4578_v58  ;;  %v3925_v58 = vld [vmem:[%s5069_s9 + $0x168] sm:$0xff]  }
 0x77c   :  { %3693 = vmatprep.subr.bf16.mxu0 %v3925_v58  ;;  %3712 = vmatpush3.bf16.msra.mxu1 %v3928_v45 }
 0x77d   :  { %3694 = vmatpush3.bf16.msra.mxu0 %v3927_v13  ;;  %3713 = vmatprep.subr.bf16.mxu1 %v3930_v16 }
 0x77e   :  { %3695 = vmatprep.subr.bf16.mxu0 %v3929_v14 }
 0x780   :  { %3714 = vmatpush3.bf16.msra.mxu1 %v3932_v20 }
 0x781   :  { %3696 = vmatpush3.bf16.msra.mxu0 %v3931_v25  ;;  %3715 = vmatprep.subr.bf16.mxu1 %v3934_v22 }
 0x782   :  { %3697 = vmatprep.subr.bf16.mxu0 %v3933_v9 }
 0x784   :  { %3716 = vmatpush3.bf16.msra.mxu1 %v3936_v24 }
 0x785   :  { %3698 = vmatpush3.bf16.msra.mxu0 %v3935_v30  ;;  %3717 = vmatprep.subr.bf16.mxu1 %v3938_v27 }
 0x786   :  { %3699 = vmatprep.subr.bf16.mxu0 %v3937_v26 }
 0x788   :  { %3718 = vmatpush3.bf16.msra.mxu1 %v3940_v17 }
 0x789   :  { %3700 = vmatpush3.bf16.msra.mxu0 %v3939_v19  ;;  %3719 = vmatprep.subr.bf16.mxu1 %v3942_v34 }
 0x78a   :  { %3701 = vmatprep.subr.bf16.mxu0 %v3941_v49 }
 0x78c   :  { %3720 = vmatpush3.bf16.msra.mxu1 %v3944_v40 }
 0x78d   :  { %3702 = vmatpush3.bf16.msra.mxu0 %v3943_v36  ;;  %3721 = vmatprep.subr.bf16.mxu1 %v3946_v47 }
 0x78e   :  { %3703 = vmatprep.subr.bf16.mxu0 %v3945_v43 }
 0x790   :  { %3722 = vmatpush3.bf16.msra.mxu1 %v3948_v3 }
 0x791   :  { %3704 = vmatpush3.bf16.msra.mxu0 %v3947_v44  ;;  %3723 = vmatprep.subr.bf16.mxu1 %v3949_v50 }
 0x794   :  { %3724 = vmatpush3.bf16.msra.mxu1 %v3950_v38 }
 0x795   :  { %3725 = vmatprep.subr.bf16.mxu1 %v3951_v60 }
 0x798   :  { %3726 = vmatpush3.bf16.msra.mxu1 %v3952_v51 }
 0x82b   :  { %v3661_v29 = vpop.f32.mrf.mxu1 }
 0x82d   :  { %v3662_v48 = vpop.f32.mrf.mxu1 }
 0x82e   :  { %v4936_v57 = vadd.f32 %v3662_v48, %v3661_v29 }
 0x82f   :  { %v3664_v59 = vpop.f32.mrf.mxu1 }
 0x831   :  { %v3665_v23 = vpop.f32.mrf.mxu1 }
 0x832   :  { %v4939_v61 = vadd.f32 %v3665_v23, %v3664_v59 }
 0x833   :  { %v2775_v63 = vpop.f32.mrf.mxu1 }
 0x834   :  { %v4942_v1 = vadd.f32 %v2775_v63, %v2714_v62 }
 0x835   :  { %v2777_v52 = vpop.f32.mrf.mxu1 }
 0x836   :  { %v2784_v4 = vand.u32 2147483647, %v4942_v1  ;;  %v4945_v53 = vadd.f32 %v2777_v52, %v2718_v42  ;;  %vm2864_vm11 = vcmp.ge.f32.partialorder %v4942_v1, 0.0 }
 0x837   :  { %v2779_v31 = vpop.f32.mrf.mxu1 }
 0x838   :  { %v2788_v5 = vmul.f32 0.70710677, %v2784_v4  ;;  %v2785_v0 = vand.u32 2147483647, %v4945_v53  ;;  %v4951_v28 = vadd.f32 %v2779_v31, %v2714_v62  ;;  %vm2865_vm12 = vcmp.ge.f32.partialorder %v4945_v53, 0.0 }
 0x839   :  { %v2781_v56 = vpop.f32.mrf.mxu1 }
 0x83a   :  { %v2792_v6 = vmul.f32 0.3275911, %v2788_v5  ;;  %v2789_v54 = vmul.f32 0.70710677, %v2785_v0  ;;  %v2786_v2 = vand.u32 2147483647, %v4951_v28  ;;  %v4955_v7 = vadd.f32 %v2781_v56, %v2718_v42 }
 0x83b   :  { %v3123_v55 = vpop.f32.mrf.mxu1  ;;  %v2844_v49 = vsub.f32 0.0, %v2788_v5  ;;  %vm2866_vm10 = vcmp.ge.f32.partialorder %v4951_v28, 0.0 }
 0x83c   :  { %v2796_v8 = vadd.f32 1.0, %v2792_v6  ;;  %v2793_v32 = vmul.f32 0.3275911, %v2789_v54  ;;  %v2790_v39 = vmul.f32 0.70710677, %v2786_v2  ;;  %v4959_v46 = vadd.f32 %v3123_v55, %v3062_v21 }
 0x83d   :  { %v2787_v10 = vand.u32 2147483647, %v4955_v7  ;;  %v3125_v58 = vpop.f32.mrf.mxu1  ;;  %v2845_v40 = vsub.f32 0.0, %v2789_v54  ;;  %v2848_v60 = vmul.f32 %v2844_v49, %v2788_v5  ;;  %vm2867_vm13 = vcmp.ge.f32.partialorder %v4955_v7, 0.0 }
 0x83e   :  { %4029 = vrcp.f32 %v2796_v8  ;;  %v2797_v12 = vadd.f32 1.0, %v2793_v32  ;;  %v2794_v35 = vmul.f32 0.3275911, %v2790_v39  ;;  %v3132_v14 = vand.u32 2147483647, %v4959_v46 }
 0x83f   :  { %v2791_v13 = vmul.f32 0.70710677, %v2787_v10  ;;  %v3127_v45 = vpop.f32.mrf.mxu1  ;;  %v4962_v16 = vadd.f32 %v3125_v58, %v3066_v37  ;;  %v2846_v47 = vsub.f32 0.0, %v2790_v39  ;;  %v2849_v33 = vmul.f32 %v2845_v40, %v2789_v54 }
 0x840   :  { %4031 = vrcp.f32 %v2797_v12  ;;  %v2798_v25 = vadd.f32 1.0, %v2794_v35  ;;  %v3136_v9 = vmul.f32 0.70710677, %v3132_v14  ;;  %v4965_v27 = vadd.f32 %v3127_v45, %v3062_v21 }
 0x841   :  { %v2795_v20 = vmul.f32 0.3275911, %v2791_v13  ;;  %v3133_v41 = vand.u32 2147483647, %v4962_v16  ;;  %v3129_v22 = vpop.f32.mrf.mxu1  ;;  %v2847_v51 = vsub.f32 0.0, %v2791_v13  ;;  %v2850_v62 = vmul.f32 %v2846_v47, %v2790_v39 }
 0x842   :  { %4033 = vrcp.f32 %v2798_v25  ;;  %v3140_v24 = vmul.f32 0.3275911, %v3136_v9  ;;  %v4967_v19 = vadd.f32 %v3129_v22, %v3066_v37  ;;  %v3134_v36 = vand.u32 2147483647, %v4965_v27 }
 0x843   :  { %v2799_v30 = vadd.f32 1.0, %v2795_v20  ;;  %v3137_v26 = vmul.f32 0.70710677, %v3133_v41  ;;  %v3192_v52 = vsub.f32 0.0, %v3136_v9  ;;  %v2852_v11 = vmul.f32 1.442695, %v2848_v60 }
 0x844   :  { %v3144_v17 = vadd.f32 1.0, %v3140_v24  ;;  %v3135_v43 = vand.u32 2147483647, %v4967_v19  ;;  %v3138_v3 = vmul.f32 0.70710677, %v3134_v36  ;;  %v2851_v0 = vmul.f32 %v2847_v51, %v2791_v13 }
 0x845   :  { %4035 = vrcp.f32 %v2799_v30  ;;  %v3141_v34 = vmul.f32 0.3275911, %v3137_v26  ;;  %v2854_v21 = vmul.f32 1.442695, %v2849_v33  ;;  %v2856_v2 = vmul.f32 1.442695, %v2850_v62 }
 0x846   :  { %4037 = vrcp.f32 %v3144_v17  ;;  %v4971_v50 = vmul.f32 0.70710677, %v3135_v43  ;;  %v3142_v29 = vmul.f32 0.3275911, %v3138_v3  ;;  %v3196_v8 = vmul.f32 %v3192_v52, %v3136_v9 }
 0x847   :  { %v3145_v44 = vadd.f32 1.0, %v3141_v34  ;;  %v3193_v32 = vsub.f32 0.0, %v3137_v26  ;;  %v2858_v58 = vmul.f32 1.442695, %v2851_v0  ;;  %v3194_v13 = vsub.f32 0.0, %v3138_v3 }
 0x848   :  { %v3143_v59 = vmul.f32 0.3275911, %v4971_v50  ;;  %v3146_v23 = vadd.f32 1.0, %v3142_v29  ;;  %v3200_v41 = vmul.f32 1.442695, %v3196_v8  ;;  %v3195_v43 = vsub.f32 0.0, %v4971_v50 }
 0x849   :  { %4039 = vrcp.f32 %v3145_v44  ;;  %v3197_v22 = vmul.f32 %v3193_v32, %v3137_v26  ;;  %v3198_v40 = vmul.f32 %v3194_v13, %v3138_v3  ;;  %vm3214_vm14 = vcmp.ge.f32.partialorder %v4965_v27, 0.0 }
 0x84a   :  { %v3147_v4 = vadd.f32 1.0, %v3143_v59  ;;  %4041 = vrcp.f32 %v3146_v23  ;;  %vm3213_vm15 = vcmp.ge.f32.partialorder %v4962_v16, 0.0  ;;  %vm3212_vm2 = vcmp.ge.f32.partialorder %v4959_v46, 0.0 }
 0x84b   :  { %v4973_v38 = vpop.eup %4029  ;;  %vm3215_vm1 = vcmp.ge.f32.partialorder %v4967_v19, 0.0 }
 0x84c   :  { %v2804_v48 = vmul.f32 1.0614054, %v4973_v38  ;;  %4043 = vrcp.f32 %v3147_v4  ;;  %v3204_v4 = vmul.f32 1.442695, %v3198_v40 }
 0x84d   :  { %v4977_v42 = vpop.eup %4031  ;;  %4045 = vpow2.f32 %v2852_v11  ;;  %v3199_v11 = vmul.f32 %v3195_v43, %v4971_v50 }
 0x84e   :  { %v2808_v63 = vadd.f32 -1.4531521, %v2804_v48  ;;  %v2805_v31 = vmul.f32 1.0614054, %v4977_v42  ;;  %4047 = vpow2.f32 %v2854_v21  ;;  %v3202_v48 = vmul.f32 1.442695, %v3197_v22 }
 0x84f   :  { %v4980_v5 = vpop.eup %4033  ;;  %4049 = vpow2.f32 %v2856_v2 }
 0x850   :  { %v2812_v56 = vmul.f32 %v4973_v38, %v2808_v63  ;;  %v2809_v6 = vadd.f32 -1.4531521, %v2805_v31  ;;  %v2806_v54 = vmul.f32 1.0614054, %v4980_v5  ;;  %4051 = vpow2.f32 %v2858_v58 }
 0x851   :  { %4053 = vpow2.f32 %v3200_v41 }
 0x852   :  { %v2816_v55 = vadd.f32 1.4214138, %v2812_v56  ;;  %v4984_v37 = vpop.eup %4035  ;;  %v2813_v39 = vmul.f32 %v4977_v42, %v2809_v6  ;;  %v2810_v10 = vadd.f32 -1.4531521, %v2806_v54  ;;  %4055 = vpow2.f32 %v3202_v48 }
 0x853   :  { %v2807_v35 = vmul.f32 1.0614054, %v4984_v37  ;;  %v4990_v25 = vpop.eup %4037  ;;  %4057 = vpow2.f32 %v3204_v4 }
 0x854   :  { %v2820_v12 = vmul.f32 %v4973_v38, %v2816_v55  ;;  %v2817_v45 = vadd.f32 1.4214138, %v2813_v39  ;;  %v2814_v14 = vmul.f32 %v4980_v5, %v2810_v10  ;;  %v3152_v17 = vmul.f32 1.0614054, %v4990_v25 }
 0x855   :  { %v2811_v9 = vadd.f32 -1.4531521, %v2807_v35  ;;  %v3206_v35 = vmul.f32 1.442695, %v3199_v11 }
 0x856   :  { %v2824_v20 = vadd.f32 -0.28449672, %v2820_v12  ;;  %v2821_v30 = vmul.f32 %v4977_v42, %v2817_v45  ;;  %v2818_v24 = vadd.f32 1.4214138, %v2814_v14  ;;  %v4994_v49 = vpop.eup %4039  ;;  %v3156_v60 = vadd.f32 -1.4531521, %v3152_v17 }
 0x857   :  { %v2815_v36 = vmul.f32 %v4984_v37, %v2811_v9  ;;  %v3153_v26 = vmul.f32 1.0614054, %v4994_v49  ;;  %v5003_v63 = vpop.eup %4041  ;;  %4059 = vpow2.f32 %v3206_v35 }
 0x858   :  { %v2828_v34 = vmul.f32 %v4973_v38, %v2824_v20  ;;  %v2825_v47 = vadd.f32 -0.28449672, %v2821_v30  ;;  %v2822_v44 = vmul.f32 %v4980_v5, %v2818_v24  ;;  %v3160_v62 = vmul.f32 %v4990_v25, %v3156_v60 }
 0x859   :  { %v2819_v29 = vadd.f32 1.4214138, %v2815_v36  ;;  %v3157_v23 = vadd.f32 -1.4531521, %v3153_v26  ;;  %v5008_v31 = vpop.eup %4043  ;;  %v3154_v55 = vmul.f32 1.0614054, %v5003_v63 }
 0x85a   :  { %v2832_v51 = vadd.f32 0.2548296, %v2828_v34  ;;  %v2829_v33 = vmul.f32 %v4977_v42, %v2825_v47  ;;  %v2826_v59 = vadd.f32 -0.28449672, %v2822_v44  ;;  %v3164_v21 = vadd.f32 1.4214138, %v3160_v62  ;;  %v4046_v50 = vpop.eup %4045 }
 0x85b   :  { %v2823_v52 = vmul.f32 %v4984_v37, %v2819_v29  ;;  %v3161_v6 = vmul.f32 %v4994_v49, %v3157_v23  ;;  %v3158_v58 = vadd.f32 -1.4531521, %v3154_v55  ;;  %v3155_v12 = vmul.f32 1.0614054, %v5008_v31  ;;  %v4048_v13 = vpop.eup %4047 }
 0x85c   :  { %v2836_v3 = vmul.f32 %v4973_v38, %v2832_v51  ;;  %v2833_v0 = vadd.f32 0.2548296, %v2829_v33  ;;  %v2830_v56 = vmul.f32 %v4980_v5, %v2826_v59  ;;  %v3168_v32 = vmul.f32 %v4990_v25, %v3164_v21  ;;  %v4050_v41 = vpop.eup %4049 }
 0x85d   :  { %v2827_v2 = vadd.f32 -0.28449672, %v2823_v52  ;;  %v3165_v39 = vadd.f32 1.4214138, %v3161_v6  ;;  %v3162_v30 = vmul.f32 %v5003_v63, %v3158_v58  ;;  %v3159_v24 = vadd.f32 -1.4531521, %v3155_v12  ;;  %v4052_v43 = vpop.eup %4051 }
 0x85e   :  { %v2840_v54 = vmul.f32 0.5, %v2836_v3  ;;  %v2837_v38 = vmul.f32 %v4977_v42, %v2833_v0  ;;  %v2834_v8 = vadd.f32 0.2548296, %v2830_v56  ;;  %v3172_v20 = vadd.f32 -0.28449672, %v3168_v32  ;;  %v4054_v62 = vpop.eup %4053 }
 0x85f   :  { %v2831_v10 = vmul.f32 %v4984_v37, %v2827_v2  ;;  %v3169_v9 = vmul.f32 %v4994_v49, %v3165_v39  ;;  %v3166_v44 = vadd.f32 1.4214138, %v3162_v30 }
 0x860   :  { %v2841_v45 = vmul.f32 0.5, %v2837_v38  ;;  %v2838_v14 = vmul.f32 %v4980_v5, %v2834_v8  ;;  %v2860_v42 = vmul.f32 %v4046_v50, %v2840_v54  ;;  %v3176_v36 = vmul.f32 %v4990_v25, %v3172_v20 }
 0x861   :  { %v2835_v22 = vadd.f32 0.2548296, %v2831_v10  ;;  %v3173_v40 = vadd.f32 -0.28449672, %v3169_v9  ;;  %v3163_v5 = vmul.f32 %v5008_v31, %v3159_v24  ;;  %v3170_v33 = vmul.f32 %v5003_v63, %v3166_v44 }
 0x862   :  { %v2861_v17 = vmul.f32 %v4048_v13, %v2841_v45  ;;  %v2842_v34 = vmul.f32 0.5, %v2838_v14  ;;  %v3180_v51 = vadd.f32 0.2548296, %v3176_v36  ;;  %v2868_v23 = vsub.f32 1.0, %v2860_v42 }
 0x863   :  { %v2839_v47 = vmul.f32 %v4984_v37, %v2835_v22  ;;  %v3177_v48 = vmul.f32 %v4994_v49, %v3173_v40  ;;  %v3167_v59 = vadd.f32 1.4214138, %v3163_v5  ;;  %v3174_v11 = vadd.f32 -0.28449672, %v3170_v33 }
 0x864   :  { %v2869_v60 = vsub.f32 1.0, %v2861_v17  ;;  %v2862_v26 = vmul.f32 %v4050_v41, %v2842_v34  ;;  %v3184_v52 = vmul.f32 %v4990_v25, %v3180_v51  ;;  %v4056_v25 = vpop.eup %4055  ;;  %v2872_v55 = vsel %vm2864_vm11, %v2868_v23, %v2860_v42 }
 0x865   :  { %v2843_v29 = vmul.f32 0.5, %v2839_v47  ;;  %v3181_v4 = vadd.f32 0.2548296, %v3177_v48  ;;  %v3171_v56 = vmul.f32 %v5008_v31, %v3167_v59  ;;  %v3178_v2 = vmul.f32 %v5003_v63, %v3174_v11 }
 0x866   :  { %v2870_v3 = vsub.f32 1.0, %v2862_v26  ;;  %v2873_v21 = vsel %vm2865_vm12, %v2869_v60, %v2861_v17  ;;  %v3188_v38 = vmul.f32 0.5, %v3184_v52 }
 0x867   :  { %v2863_v37 = vmul.f32 %v4052_v43, %v2843_v29  ;;  %v3185_v54 = vmul.f32 %v4994_v49, %v3181_v4  ;;  %v3175_v8 = vadd.f32 -0.28449672, %v3171_v56  ;;  %v3182_v10 = vadd.f32 0.2548296, %v3178_v2  ;;  %v3683_v29 = vpop.f32.mrf.mxu0  ;;  %v3560_v2 = vld [vmem:[%s5070_s10] ss:$0 sm:$0xff] }
 0x868   :  { %v2874_v0 = vsel %vm2866_vm10, %v2870_v3, %v2862_v26  ;;  %v2877_v58 = vmul.f32 %v2873_v21, %v4945_v53  ;;  %v2876_v49 = vmul.f32 %v2872_v55, %v4942_v1  ;;  %v3208_v41 = vmul.f32 %v4054_v62, %v3188_v38 }
 0x869   :  { %v2871_v6 = vsub.f32 1.0, %v2863_v37  ;;  %v2878_v32 = vmul.f32 %v2874_v0, %v4951_v28  ;;  %v3189_v50 = vmul.f32 0.5, %v3185_v54  ;;  %v3179_v35 = vmul.f32 %v5008_v31, %v3175_v8  ;;  %v4058_v28 = vpop.eup %4057  ;;  %v3684_v48 = vpop.f32.mrf.mxu0 }
 0x86a   :  { %v3186_v13 = vmul.f32 %v5003_v63, %v3182_v10  ;;  %v4060_v24 = vpop.eup %4059  ;;  %v3216_v17 = vsub.f32 1.0, %v3208_v41  ;;  %v3685_v52 = vadd.f32 %v3684_v48, %v3683_v29 }
 0x86b   :  { %v2875_v39 = vsel %vm2867_vm13, %v2871_v6, %v2863_v37  ;;  %v3209_v45 = vmul.f32 %v4056_v25, %v3189_v50  ;;  %v3183_v14 = vadd.f32 0.2548296, %v3179_v35  ;;  %v2880_v9 = vpack.c.bf16 %v2878_v32, %v2876_v49  ;;  %v3686_v33 = vpop.f32.mrf.mxu0 }
 0x86c   :  { %v2879_v12 = vmul.f32 %v2875_v39, %v4955_v7  ;;  %v3190_v42 = vmul.f32 0.5, %v3186_v13  ;;  %v3220_v43 = vsel %vm3212_vm2, %v3216_v17, %v3208_v41 }
 0x86d   :  { %v3187_v22 = vmul.f32 %v5008_v31, %v3183_v14  ;;  %v3217_v53 = vsub.f32 1.0, %v3209_v45  ;;  %v3224_v60 = vmul.f32 %v3220_v43, %v4959_v46  ;;  %v3687_v59 = vpop.f32.mrf.mxu0 }
 0x86e   :  { %v2881_v20 = vpack.c.bf16 %v2879_v12, %v2877_v58  ;;  %v3210_v30 = vmul.f32 %v4058_v28, %v3190_v42 }
 0x86f   :  { %v3191_v7 = vmul.f32 0.5, %v3187_v22  ;;  %v3221_v36 = vsel %vm3213_vm15, %v3217_v53, %v3209_v45 }
 0x870   :  { %3042 = vmatprep.mubr.bf16.mxu0 %v2881_v20  ;;  %v3218_v34 = vsub.f32 1.0, %v3210_v30  ;;  %v3225_v44 = vmul.f32 %v3221_v36, %v4962_v16  ;;  %v2699_v16 = vadd.f32 %v3685_v52, %v4936_v57 }
 0x871   :  { %3043 = vmatmul.mubr.bf16.vlgmr.msra.gmra.mxu0 %v2880_v9  ;;  %v3211_v1 = vmul.f32 %v4060_v24, %v3191_v7 }
 0x872   :  { %v3222_v63 = vsel %vm3214_vm14, %v3218_v34, %v3210_v30 }
 0x873   :  { %v3219_v40 = vsub.f32 1.0, %v3211_v1  ;;  %v3226_v31 = vmul.f32 %v3222_v63, %v4965_v27 }
 0x875   :  { %v3223_v47 = vsel %vm3215_vm1, %v3219_v40, %v3211_v1  ;;  %v3228_v51 = vpack.c.bf16 %v3226_v31, %v3224_v60 }
 0x876   :  { %v3227_v5 = vmul.f32 %v3223_v47, %v4967_v19  ;;  %v3688_v19 = vadd.f32 %v3687_v59, %v3686_v33 }
 0x878   :  { %v3229_v26 = vpack.c.bf16 %v3227_v5, %v3225_v44  ;;  %v2702_v6 = vadd.f32 %v3688_v19, %v4939_v61 }
 0x87a   :  { %3390 = vmatprep.mubr.bf16.mxu1 %v3229_v26 }
 0x87b   :  { %3391 = vmatmul.mubr.bf16.vlgmr.msra.gmra.mxu1 %v3228_v51 }
 0x931   :  { %v3705_v62 = vpop.f32.mrf.mxu0 }
 0x933   :  { %v3706_v23 = vpop.f32.mrf.mxu0 }
 0x934   :  { %v3707_v27 = vadd.f32 %v3706_v23, %v3705_v62 }
 0x935   :  { %v3708_v3 = vpop.f32.mrf.mxu0 }
 0x936   :  { %v3051_v46 = vadd.f32 %v3707_v27, %v2699_v16 }
 0x937   :  { %v3709_v37 = vpop.f32.mrf.mxu0 }
 0x938   :  { %v3710_v0 = vadd.f32 %v3709_v37, %v3708_v3 }
 0x93a   :  { %v3052_v55 = vadd.f32 %v3710_v0, %v2702_v6 }
 0x93b   :  { %v3727_v4 = vpop.f32.mrf.mxu1 }
 0x93d   :  { %v3728_v11 = vpop.f32.mrf.mxu1 }
 0x93e   :  { %v3729_v56 = vadd.f32 %v3728_v11, %v3727_v4 }
 0x93f   :  { %v3730_v21 = vpop.f32.mrf.mxu1 }
 0x940   :  { %v3399_v54 = vadd.f32 %v3729_v56, %v3051_v46 }
 0x941   :  { %v3731_v25 = vpop.f32.mrf.mxu1 }
 0x942   :  { %v3401_v38 = vadd.f32 %v3399_v54, %v4542_v18  ;;  %v3732_v8 = vadd.f32 %v3731_v25, %v3730_v21 }
 0x944   :  { %v3410_v32 = vadd.f32 %v3560_v2, %v3401_v38  ;;  %v3400_v57 = vadd.f32 %v3732_v8, %v3052_v55 }
 0x946   :  { %3412 = vst.msk [vmem:[#allocation2] sm:$0xff] %vm42_vm0, %v3410_v32  ;;  %v3402_v39 = vadd.f32 %v3400_v57, %v4537_v15 }
 0x948   :  { %v3411_v61 = vadd.f32 %v3560_v2, %v3402_v39 }
 0x94a   :  { %3413 = vst.msk [vmem:[#allocation2 + $0x8] sm:$0xff] %vm42_vm0, %v3411_v61 }
 0x94b   :  { %4074 = shalt.err (!%p4071_p4)
}
 0x94c   :  { %s4089_s10 = smov 128   ;;  %s4090_s6 = smov 8  }
 0x94d   :  { %3425 = dma.vmem_to_hbm [thread:$0]  %s3420_s19, 256, %s5071_s11, [#allocation3], %s4089_s10, %s4089_s10, %s4090_s6  }
 0x94e   :  { %4083 = dma.done.wait [#allocation3], 256  }
 0x94f   :  { %4084 = vsyncadd [#allocation3], 4294967040 }
 0x950   :  { %3429 = vsyncpa [#allocation3], 1 }

</bundles_post_ra>
